<compile_context>
chip_gen: v7x
topology: tpu7x:2x2x1
jax: 0.10.0
libtpu: 0.0.40
codegen_flags: <defaults>
</compile_context>

<pallas_src>
import functools
import re

import jax
import jax.numpy as jnp
from jax.experimental import pallas as pl
from jax.experimental.pallas import tpu as pltpu

LANE = 128  # TPU lane width; hidden feature dims are padded to this.


def _round_up(n, m):
    return ((n + m - 1) // m) * m


def _tpu_generation():
    """Best-effort TPU generation from device_kind (e.g. 'TPU v5 lite' -> 5)."""
    try:
        kind = jax.devices()[0].device_kind
        m = re.search(r"(\d+)", kind)
        return int(m.group(1)) if m else None
    except Exception:
        return None


def _mlp_kernel(x_ref, *refs, tanh_bf16: bool, n_split: int):
    """Fused MLP: (Linear -> Tanh) x4 then Linear, all params resident in VMEM.

    refs = (w1, b1, ..., w5, b5, out).  Weights bf16, biases f32.  Matmuls
    accumulate in f32 (preferred_element_type).  The batch tile is split into
    `n_split` independent sub-chains so the MXU of one half overlaps the
    tanh/bias path of the other.
    """
    o_ref = refs[-1]
    wb = refs[:-1]
    n_layers = len(wb) // 2
    tile_b = x_ref.shape[0]
    sub = tile_b // n_split

    # In-kernel cast of the raw (tile_b, d_in) f32 input to the bf16 MXU feed.
    x = x_ref[...].astype(jnp.bfloat16)
    hs = [x[i * sub:(i + 1) * sub, :] for i in range(n_split)]

    for layer in range(n_layers):
        w = wb[2 * layer][...]
        b = wb[2 * layer + 1][...]
        # Independent dots for each sub-chain (exposes MXU/EUP overlap).
        zs = [jnp.dot(h, w, preferred_element_type=jnp.float32) + b for h in hs]
        if layer < n_layers - 1:
            if tanh_bf16:
                # v6e/v7x: bf16 EUP path, no extra cast.
                hs = [jnp.tanh(z.astype(jnp.bfloat16)) for z in zs]
            else:
                # v5e: f32 EUP, cast back to bf16 only for the next MXU feed.
                hs = [jnp.tanh(z).astype(jnp.bfloat16) for z in zs]
        else:
            for i, z in enumerate(zs):
                o_ref[i * sub:(i + 1) * sub, :] = z.astype(o_ref.dtype)


def net_forward(x, params, *, output_dim):
    """x: (B, input_dim) f32.  params: list of (W bf16 (in_p, out_p), b f32 (1, out_p))."""
    B, d_in = x.shape
    d_out = params[-1][0].shape[1]
    assert d_out == output_dim

    gen = _tpu_generation()
    tanh_bf16 = (gen is None) or (gen >= 6)          # bf16 EUP exists on v6e/v7x
    n_tiles = 2 if (gen is not None and gen >= 7 and B >= 16) else 1  # 2 TCs on v7x
    tile_b = _round_up(pl.cdiv(B, n_tiles), 8)
    Bp = tile_b * n_tiles
    n_split = 2 if tile_b % 32 == 0 else 1           # interleaved sub-chains

    # Only pad the batch when it doesn't already divide into the chosen tiles.
    xp = x if Bp == B else jnp.pad(x, ((0, Bp - B), (0, 0)))

    # --- Specs -------------------------------------------------------------
    in_specs = [pl.BlockSpec((tile_b, d_in), lambda i: (i, 0))]
    flat_params = []
    for (w, b) in params:
        # Full-array blocks with a constant index_map -> resident in VMEM.
        in_specs.append(pl.BlockSpec(w.shape, lambda i: (0, 0)))
        in_specs.append(pl.BlockSpec(b.shape, lambda i: (0, 0)))
        flat_params.extend([w, b])
    out_spec = pl.BlockSpec((tile_b, output_dim), lambda i: (i, 0))

    # --- VMEM budget from actual footprint (not a blanket 32 MiB) ----------
    param_bytes = sum(w.size * w.dtype.itemsize + b.size * b.dtype.itemsize
                      for (w, b) in params)
    vmem_bytes = 2 * param_bytes                                  # resident (+headroom)
    vmem_bytes += 2 * tile_b * d_in * xp.dtype.itemsize           # double-buffered input
    vmem_bytes += 2 * tile_b * output_dim * 4                     # double-buffered output
    vmem_bytes += 8 * tile_b * LANE * 4                           # live f32 intermediates
    vmem_limit = int(min(max(2 * vmem_bytes, 4 << 20), 64 << 20))

    # --- Cost hint ----------------------------------------------------------
    flops = 0
    transcendentals = 0
    bytes_accessed = xp.size * xp.dtype.itemsize + Bp * output_dim * 4
    for li, (w, b) in enumerate(params):
        flops += 2 * Bp * w.shape[0] * w.shape[1]
        if li != len(params) - 1:
            transcendentals += Bp * w.shape[1]
        bytes_accessed += w.size * w.dtype.itemsize + b.size * b.dtype.itemsize

    kernel = functools.partial(_mlp_kernel, tanh_bf16=tanh_bf16, n_split=n_split)

    y = pl.pallas_call(
        kernel,
        out_shape=jax.ShapeDtypeStruct((Bp, output_dim), jnp.float32),
        grid_spec=pl.GridSpec(
            grid=(n_tiles,),
            in_specs=in_specs,
            out_specs=out_spec,
        ),
        compiler_params=pltpu.CompilerParams(
            dimension_semantics=("parallel",),
            vmem_limit_bytes=vmem_limit,
        ),
        cost_estimate=pl.CostEstimate(
            flops=flops,
            transcendentals=transcendentals,
            bytes_accessed=bytes_accessed,
        ),
    )(xp, *flat_params)

    return y if Bp == B else y[:B]


def init_params(key, input_dim, output_dim):
    """Init matching Net.__init__ layer dims, stored pre-transposed (in, out).

      L1: input_dim   -> 2*input_dim
      L2: 2*input_dim -> input_dim
      L3: input_dim   -> input_dim
      L4: input_dim   -> mid,  mid = int((input_dim+output_dim)/2 + 0.5)
      L5: mid         -> output_dim

    Hidden output dims are zero-padded to 128 lanes; each layer's input dim is
    padded to match the previous layer's padded output.  Layer-1 input and
    layer-5 output stay at their real sizes (x is fed raw; output is stored
    narrow).  Zero padding keeps the math exact (tanh(0)=0).
    Weights bf16, biases f32 (1, out_pad).
    """
    mid = int((input_dim + output_dim) / 2 + 0.5)
    dims = [(input_dim, input_dim * 2),
            (input_dim * 2, input_dim),
            (input_dim, input_dim),
            (input_dim, mid),
            (mid, output_dim)]
    params = []
    prev_out_pad = input_dim                      # layer-1 input stays unpadded
    for li, (din, dout) in enumerate(dims):
        key, kw, kb = jax.random.split(key, 3)
        bound = 1.0 / float(din) ** 0.5
        w = jax.random.uniform(kw, (din, dout), jnp.float32, -bound, bound)
        b = jax.random.uniform(kb, (dout,), jnp.float32, -bound, bound)
        din_p = prev_out_pad
        dout_p = dout if li == len(dims) - 1 else _round_up(dout, LANE)
        w_pad = jnp.zeros((din_p, dout_p), jnp.float32).at[:din, :dout].set(w)
        b_pad = jnp.zeros((1, dout_p), jnp.float32).at[0, :dout].set(b)
        params.append((w_pad.astype(jnp.bfloat16), b_pad))
        prev_out_pad = dout_p
    return params


def net_forward_ref(x, params, *, output_dim, tanh_bf16):
    """Pure-JAX reference mirroring the kernel's bf16-feed / f32-accumulate math."""
    h = x.astype(jnp.bfloat16)
    z = None
    for i, (w, b) in enumerate(params):
        z = jnp.dot(h.astype(jnp.float32), w.astype(jnp.float32),
                    precision=jax.lax.Precision.HIGHEST) + b
        if i != len(params) - 1:
            if tanh_bf16:
                h = jnp.tanh(z.astype(jnp.bfloat16))
            else:
                h = jnp.tanh(z).astype(jnp.bfloat16)
    return z[:, :output_dim]


if __name__ == "__main__":
    input_dim = 16
    hidden_dim = 32   # present in Net.__init__ signature but unused by the module
    output_dim = 4
    batch = 256       # 1 tile on v5e/v6e, 2 equal "parallel" tiles on v7x

    key = jax.random.PRNGKey(0)
    key, kx = jax.random.split(key)
    x = jax.random.normal(kx, (batch, input_dim), jnp.float32)
    params = init_params(key, input_dim, output_dim)

    fwd = jax.jit(functools.partial(net_forward, output_dim=output_dim))
    y = jax.block_until_ready(fwd(x, params))

    gen = _tpu_generation()
    tanh_bf16 = (gen is None) or (gen >= 6)
    y_ref = net_forward_ref(x, params, output_dim=output_dim, tanh_bf16=tanh_bf16)
    assert y.shape == (batch, output_dim)
    assert jnp.allclose(y, y_ref, atol=1e-2, rtol=1e-2), "mismatch vs reference"

    print("KERNEL_OK")
</pallas_src>

<mosaic_0001>
module attributes {stable_mosaic.version = 11 : i64} {
  func.func @_mlp_kernel(%arg0: i32, %arg1: memref<256x16xf32, #tpu.memory_space<vmem>>, %arg2: memref<16x128xbf16, #tpu.memory_space<vmem>>, %arg3: memref<1x128xf32, #tpu.memory_space<vmem>>, %arg4: memref<128x128xbf16, #tpu.memory_space<vmem>>, %arg5: memref<1x128xf32, #tpu.memory_space<vmem>>, %arg6: memref<128x128xbf16, #tpu.memory_space<vmem>>, %arg7: memref<1x128xf32, #tpu.memory_space<vmem>>, %arg8: memref<128x128xbf16, #tpu.memory_space<vmem>>, %arg9: memref<1x128xf32, #tpu.memory_space<vmem>>, %arg10: memref<128x4xbf16, #tpu.memory_space<vmem>>, %arg11: memref<1x4xf32, #tpu.memory_space<vmem>>, %arg12: memref<256x4xf32, #tpu.memory_space<vmem>>) attributes {dimension_semantics = [#tpu.dimension_semantics<parallel>], iteration_bounds = array<i64: 1>, scalar_prefetch = 0 : i64, scratch_operands = 0 : i64, tpu.core_type = #tpu.core_type<tc>, window_params = [{transform_indices = @transform_0, window_bounds = array<i64: 256, 16>}, {pipeline_mode = #tpu.pipeline_mode<synchronous>, transform_indices = @transform_1, window_bounds = array<i64: 16, 128>}, {pipeline_mode = #tpu.pipeline_mode<synchronous>, transform_indices = @transform_2, window_bounds = array<i64: 1, 128>}, {pipeline_mode = #tpu.pipeline_mode<synchronous>, transform_indices = @transform_3, window_bounds = array<i64: 128, 128>}, {pipeline_mode = #tpu.pipeline_mode<synchronous>, transform_indices = @transform_4, window_bounds = array<i64: 1, 128>}, {pipeline_mode = #tpu.pipeline_mode<synchronous>, transform_indices = @transform_5, window_bounds = array<i64: 128, 128>}, {pipeline_mode = #tpu.pipeline_mode<synchronous>, transform_indices = @transform_6, window_bounds = array<i64: 1, 128>}, {pipeline_mode = #tpu.pipeline_mode<synchronous>, transform_indices = @transform_7, window_bounds = array<i64: 128, 128>}, {pipeline_mode = #tpu.pipeline_mode<synchronous>, transform_indices = @transform_8, window_bounds = array<i64: 1, 128>}, {pipeline_mode = #tpu.pipeline_mode<synchronous>, transform_indices = @transform_9, window_bounds = array<i64: 128, 4>}, {pipeline_mode = #tpu.pipeline_mode<synchronous>, transform_indices = @transform_10, window_bounds = array<i64: 1, 4>}, {transform_indices = @transform_11, window_bounds = array<i64: 256, 4>}]} {
    %c0 = arith.constant 0 : index
    %c0_0 = arith.constant 0 : index
    %0 = vector.load %arg1[%c0, %c0_0] : memref<256x16xf32, #tpu.memory_space<vmem>>, vector<256x16xf32>
    %1 = arith.truncf %0 : vector<256x16xf32> to vector<256x16xbf16>
    %2 = vector.extract_strided_slice %1 {offsets = [0, 0], sizes = [128, 16], strides = [1, 1]} : vector<256x16xbf16> to vector<128x16xbf16>
    %3 = vector.extract_strided_slice %1 {offsets = [128, 0], sizes = [128, 16], strides = [1, 1]} : vector<256x16xbf16> to vector<128x16xbf16>
    %c0_1 = arith.constant 0 : index
    %c0_2 = arith.constant 0 : index
    %4 = vector.load %arg2[%c0_1, %c0_2] : memref<16x128xbf16, #tpu.memory_space<vmem>>, vector<16x128xbf16>
    %c0_3 = arith.constant 0 : index
    %c0_4 = arith.constant 0 : index
    %5 = vector.load %arg3[%c0_3, %c0_4] : memref<1x128xf32, #tpu.memory_space<vmem>>, vector<1x128xf32>
    %cst = arith.constant dense<0.000000e+00> : vector<128x128xf32>
    %6 = tpu.matmul %2, %4, %cst {dimension_numbers = #tpu.dot_dimension_numbers<[1], [0], [0], [1], [0, 0, 1, 1], [], []>} : vector<128x16xbf16>, vector<16x128xbf16>, vector<128x128xf32> -> vector<128x128xf32>
    %7 = vector.broadcast %5 : vector<1x128xf32> to vector<128x128xf32>
    %8 = arith.addf %6, %7 : vector<128x128xf32>
    %cst_5 = arith.constant dense<0.000000e+00> : vector<128x128xf32>
    %9 = tpu.matmul %3, %4, %cst_5 {dimension_numbers = #tpu.dot_dimension_numbers<[1], [0], [0], [1], [0, 0, 1, 1], [], []>} : vector<128x16xbf16>, vector<16x128xbf16>, vector<128x128xf32> -> vector<128x128xf32>
    %10 = vector.broadcast %5 : vector<1x128xf32> to vector<128x128xf32>
    %11 = arith.addf %9, %10 : vector<128x128xf32>
    %12 = arith.truncf %8 : vector<128x128xf32> to vector<128x128xbf16>
    %13 = math.tanh %12 : vector<128x128xbf16>
    %14 = arith.truncf %11 : vector<128x128xf32> to vector<128x128xbf16>
    %15 = math.tanh %14 : vector<128x128xbf16>
    %c0_6 = arith.constant 0 : index
    %c0_7 = arith.constant 0 : index
    %16 = vector.load %arg4[%c0_6, %c0_7] : memref<128x128xbf16, #tpu.memory_space<vmem>>, vector<128x128xbf16>
    %c0_8 = arith.constant 0 : index
    %c0_9 = arith.constant 0 : index
    %17 = vector.load %arg5[%c0_8, %c0_9] : memref<1x128xf32, #tpu.memory_space<vmem>>, vector<1x128xf32>
    %cst_10 = arith.constant dense<0.000000e+00> : vector<128x128xf32>
    %18 = tpu.matmul %13, %16, %cst_10 {dimension_numbers = #tpu.dot_dimension_numbers<[1], [0], [0], [1], [0, 0, 1, 1], [], []>} : vector<128x128xbf16>, vector<128x128xbf16>, vector<128x128xf32> -> vector<128x128xf32>
    %19 = vector.broadcast %17 : vector<1x128xf32> to vector<128x128xf32>
    %20 = arith.addf %18, %19 : vector<128x128xf32>
    %cst_11 = arith.constant dense<0.000000e+00> : vector<128x128xf32>
    %21 = tpu.matmul %15, %16, %cst_11 {dimension_numbers = #tpu.dot_dimension_numbers<[1], [0], [0], [1], [0, 0, 1, 1], [], []>} : vector<128x128xbf16>, vector<128x128xbf16>, vector<128x128xf32> -> vector<128x128xf32>
    %22 = vector.broadcast %17 : vector<1x128xf32> to vector<128x128xf32>
    %23 = arith.addf %21, %22 : vector<128x128xf32>
    %24 = arith.truncf %20 : vector<128x128xf32> to vector<128x128xbf16>
    %25 = math.tanh %24 : vector<128x128xbf16>
    %26 = arith.truncf %23 : vector<128x128xf32> to vector<128x128xbf16>
    %27 = math.tanh %26 : vector<128x128xbf16>
    %c0_12 = arith.constant 0 : index
    %c0_13 = arith.constant 0 : index
    %28 = vector.load %arg6[%c0_12, %c0_13] : memref<128x128xbf16, #tpu.memory_space<vmem>>, vector<128x128xbf16>
    %c0_14 = arith.constant 0 : index
    %c0_15 = arith.constant 0 : index
    %29 = vector.load %arg7[%c0_14, %c0_15] : memref<1x128xf32, #tpu.memory_space<vmem>>, vector<1x128xf32>
    %cst_16 = arith.constant dense<0.000000e+00> : vector<128x128xf32>
    %30 = tpu.matmul %25, %28, %cst_16 {dimension_numbers = #tpu.dot_dimension_numbers<[1], [0], [0], [1], [0, 0, 1, 1], [], []>} : vector<128x128xbf16>, vector<128x128xbf16>, vector<128x128xf32> -> vector<128x128xf32>
    %31 = vector.broadcast %29 : vector<1x128xf32> to vector<128x128xf32>
    %32 = arith.addf %30, %31 : vector<128x128xf32>
    %cst_17 = arith.constant dense<0.000000e+00> : vector<128x128xf32>
    %33 = tpu.matmul %27, %28, %cst_17 {dimension_numbers = #tpu.dot_dimension_numbers<[1], [0], [0], [1], [0, 0, 1, 1], [], []>} : vector<128x128xbf16>, vector<128x128xbf16>, vector<128x128xf32> -> vector<128x128xf32>
    %34 = vector.broadcast %29 : vector<1x128xf32> to vector<128x128xf32>
    %35 = arith.addf %33, %34 : vector<128x128xf32>
    %36 = arith.truncf %32 : vector<128x128xf32> to vector<128x128xbf16>
    %37 = math.tanh %36 : vector<128x128xbf16>
    %38 = arith.truncf %35 : vector<128x128xf32> to vector<128x128xbf16>
    %39 = math.tanh %38 : vector<128x128xbf16>
    %c0_18 = arith.constant 0 : index
    %c0_19 = arith.constant 0 : index
    %40 = vector.load %arg8[%c0_18, %c0_19] : memref<128x128xbf16, #tpu.memory_space<vmem>>, vector<128x128xbf16>
    %c0_20 = arith.constant 0 : index
    %c0_21 = arith.constant 0 : index
    %41 = vector.load %arg9[%c0_20, %c0_21] : memref<1x128xf32, #tpu.memory_space<vmem>>, vector<1x128xf32>
    %cst_22 = arith.constant dense<0.000000e+00> : vector<128x128xf32>
    %42 = tpu.matmul %37, %40, %cst_22 {dimension_numbers = #tpu.dot_dimension_numbers<[1], [0], [0], [1], [0, 0, 1, 1], [], []>} : vector<128x128xbf16>, vector<128x128xbf16>, vector<128x128xf32> -> vector<128x128xf32>
    %43 = vector.broadcast %41 : vector<1x128xf32> to vector<128x128xf32>
    %44 = arith.addf %42, %43 : vector<128x128xf32>
    %cst_23 = arith.constant dense<0.000000e+00> : vector<128x128xf32>
    %45 = tpu.matmul %39, %40, %cst_23 {dimension_numbers = #tpu.dot_dimension_numbers<[1], [0], [0], [1], [0, 0, 1, 1], [], []>} : vector<128x128xbf16>, vector<128x128xbf16>, vector<128x128xf32> -> vector<128x128xf32>
    %46 = vector.broadcast %41 : vector<1x128xf32> to vector<128x128xf32>
    %47 = arith.addf %45, %46 : vector<128x128xf32>
    %48 = arith.truncf %44 : vector<128x128xf32> to vector<128x128xbf16>
    %49 = math.tanh %48 : vector<128x128xbf16>
    %50 = arith.truncf %47 : vector<128x128xf32> to vector<128x128xbf16>
    %51 = math.tanh %50 : vector<128x128xbf16>
    %c0_24 = arith.constant 0 : index
    %c0_25 = arith.constant 0 : index
    %52 = vector.load %arg10[%c0_24, %c0_25] : memref<128x4xbf16, #tpu.memory_space<vmem>>, vector<128x4xbf16>
    %c0_26 = arith.constant 0 : index
    %c0_27 = arith.constant 0 : index
    %53 = vector.load %arg11[%c0_26, %c0_27] : memref<1x4xf32, #tpu.memory_space<vmem>>, vector<1x4xf32>
    %cst_28 = arith.constant dense<0.000000e+00> : vector<128x4xf32>
    %54 = tpu.matmul %49, %52, %cst_28 {dimension_numbers = #tpu.dot_dimension_numbers<[1], [0], [0], [1], [0, 0, 1, 1], [], []>} : vector<128x128xbf16>, vector<128x4xbf16>, vector<128x4xf32> -> vector<128x4xf32>
    %55 = vector.broadcast %53 : vector<1x4xf32> to vector<128x4xf32>
    %56 = arith.addf %54, %55 : vector<128x4xf32>
    %cst_29 = arith.constant dense<0.000000e+00> : vector<128x4xf32>
    %57 = tpu.matmul %51, %52, %cst_29 {dimension_numbers = #tpu.dot_dimension_numbers<[1], [0], [0], [1], [0, 0, 1, 1], [], []>} : vector<128x128xbf16>, vector<128x4xbf16>, vector<128x4xf32> -> vector<128x4xf32>
    %58 = vector.broadcast %53 : vector<1x4xf32> to vector<128x4xf32>
    %59 = arith.addf %57, %58 : vector<128x4xf32>
    %c0_30 = arith.constant 0 : index
    %c0_31 = arith.constant 0 : index
    %60 = vector.load %arg12[%c0_30, %c0_31] : memref<256x4xf32, #tpu.memory_space<vmem>>, vector<128x4xf32>
    tpu.vector_store %arg12[%c0_30, %c0_31], %56 {strides = array<i32>} : memref<256x4xf32, #tpu.memory_space<vmem>>, vector<128x4xf32>,
    %c128 = arith.constant 128 : index
    %c0_32 = arith.constant 0 : index
    %61 = vector.load %arg12[%c128, %c0_32] : memref<256x4xf32, #tpu.memory_space<vmem>>, vector<128x4xf32>
    tpu.vector_store %arg12[%c128, %c0_32], %59 {strides = array<i32>} : memref<256x4xf32, #tpu.memory_space<vmem>>, vector<128x4xf32>,
    return
  }
  func.func @transform_0(%arg0: i32) -> (i32, i32) {
    %c0_i32 = arith.constant 0 : i32
    %c0_i32_0 = arith.constant 0 : i32
    return %arg0, %c0_i32 : i32, i32
  }
  func.func @transform_1(%arg0: i32) -> (i32, i32) {
    %c0_i32 = arith.constant 0 : i32
    %c0_i32_0 = arith.constant 0 : i32
    %c0_i32_1 = arith.constant 0 : i32
    return %c0_i32, %c0_i32_0 : i32, i32
  }
  func.func @transform_2(%arg0: i32) -> (i32, i32) {
    %c0_i32 = arith.constant 0 : i32
    %c0_i32_0 = arith.constant 0 : i32
    %c0_i32_1 = arith.constant 0 : i32
    return %c0_i32, %c0_i32_0 : i32, i32
  }
  func.func @transform_3(%arg0: i32) -> (i32, i32) {
    %c0_i32 = arith.constant 0 : i32
    %c0_i32_0 = arith.constant 0 : i32
    %c0_i32_1 = arith.constant 0 : i32
    return %c0_i32, %c0_i32_0 : i32, i32
  }
  func.func @transform_4(%arg0: i32) -> (i32, i32) {
    %c0_i32 = arith.constant 0 : i32
    %c0_i32_0 = arith.constant 0 : i32
    %c0_i32_1 = arith.constant 0 : i32
    return %c0_i32, %c0_i32_0 : i32, i32
  }
  func.func @transform_5(%arg0: i32) -> (i32, i32) {
    %c0_i32 = arith.constant 0 : i32
    %c0_i32_0 = arith.constant 0 : i32
    %c0_i32_1 = arith.constant 0 : i32
    return %c0_i32, %c0_i32_0 : i32, i32
  }
  func.func @transform_6(%arg0: i32) -> (i32, i32) {
    %c0_i32 = arith.constant 0 : i32
    %c0_i32_0 = arith.constant 0 : i32
    %c0_i32_1 = arith.constant 0 : i32
    return %c0_i32, %c0_i32_0 : i32, i32
  }
  func.func @transform_7(%arg0: i32) -> (i32, i32) {
    %c0_i32 = arith.constant 0 : i32
    %c0_i32_0 = arith.constant 0 : i32
    %c0_i32_1 = arith.constant 0 : i32
    return %c0_i32, %c0_i32_0 : i32, i32
  }
  func.func @transform_8(%arg0: i32) -> (i32, i32) {
    %c0_i32 = arith.constant 0 : i32
    %c0_i32_0 = arith.constant 0 : i32
    %c0_i32_1 = arith.constant 0 : i32
    return %c0_i32, %c0_i32_0 : i32, i32
  }
  func.func @transform_9(%arg0: i32) -> (i32, i32) {
    %c0_i32 = arith.constant 0 : i32
    %c0_i32_0 = arith.constant 0 : i32
    %c0_i32_1 = arith.constant 0 : i32
    return %c0_i32, %c0_i32_0 : i32, i32
  }
  func.func @transform_10(%arg0: i32) -> (i32, i32) {
    %c0_i32 = arith.constant 0 : i32
    %c0_i32_0 = arith.constant 0 : i32
    %c0_i32_1 = arith.constant 0 : i32
    return %c0_i32, %c0_i32_0 : i32, i32
  }
  func.func @transform_11(%arg0: i32) -> (i32, i32) {
    %c0_i32 = arith.constant 0 : i32
    %c0_i32_0 = arith.constant 0 : i32
    return %arg0, %c0_i32 : i32, i32
  }
}

</mosaic_0001>

<bundles_post_ra>
// kernel: net_forward.1
= control target key start
LH: loop header
LB: loop body
LE: loop exit
PB: predicated region body
PF: predicated region fallthrough
CT: control target
= control target key end

     0   :  { %vm102_vm0 = vcmask 130048   ;;  %vm1533_vm1 = vcmask 31744   ;;  %s2825_s1 = inlined_call_operand.vmem [shape: bf16[16,128], index: 1, kind: input, shape index: {}]   ;;  %s2826_s0 = inlined_call_operand.vmem [shape: f32[256,16], index: 0, kind: input, shape index: {}]   ;;  %s2827_s3 = inlined_call_operand.vmem [shape: bf16[128,128], index: 3, kind: input, shape index: {}]   ;;  %s2828_s5 = inlined_call_operand.vmem [shape: bf16[128,128], index: 5, kind: input, shape index: {}]   ;;  %s2829_s2 = inlined_call_operand.vmem [shape: f32[1,128], index: 2, kind: input, shape index: {}]   ;;  %s2830_s7 = inlined_call_operand.vmem [shape: bf16[128,128], index: 7, kind: input, shape index: {}]   ;;  %s2831_s4 = inlined_call_operand.vmem [shape: f32[1,128], index: 4, kind: input, shape index: {}]   ;;  %s2832_s9 = inlined_call_operand.vmem [shape: bf16[128,4], index: 9, kind: input, shape index: {}]   ;;  %s2833_s6 = inlined_call_operand.vmem [shape: f32[1,128], index: 6, kind: input, shape index: {}]   ;;  %s2834_s8 = inlined_call_operand.vmem [shape: f32[1,128], index: 8, kind: input, shape index: {}]   ;;  %s2835_s10 = inlined_call_operand.vmem [shape: f32[1,4], index: 10, kind: input, shape index: {}]   ;;  %s2836_s11 = inlined_call_operand.vmem [shape: f32[256,4], index: 11, kind: output, shape index: {}]  }
   0x1   :  { %v2062_v0 = vld [vmem:[%s2825_s1] sm:$0xff]   ;;  %v40_v2 = vld [vmem:[%s2826_s0 + $0x8] sm:$0xff]  ;;  %v41_v6 = vld [vmem:[%s2826_s0 + $0x10] sm:$0xff] }
   0x2   :  { %v39_v1 = vld [vmem:[%s2826_s0] sm:$0xff]  ;;  %1770 = vmatprep.subr.bf16.mxu0 %v2062_v0  ;;  %1788 = vmatprep.subr.bf16.mxu1 %v2062_v0  ;;  %v56_v5 = vld [vmem:[%s2826_s0 + $0x88] sm:$0xff]  ;;  %v42_v7 = vld [vmem:[%s2826_s0 + $0x18] sm:$0xff] }
   0x3   :  { %v55_v3 = vld [vmem:[%s2826_s0 + $0x80] sm:$0xff]  ;;  %v71_v4 = vpack.c.bf16 %v40_v2, %v39_v1  ;;  %1771 = vmatpush3.bf16.msra.mxu0 %v2062_v0  ;;  %1789 = vmatpush3.bf16.msra.mxu1 %v2062_v0  ;;  %v72_v9 = vpack.c.bf16 %v42_v7, %v41_v6  ;;  %v57_v10 = vld [vmem:[%s2826_s0 + $0x90] sm:$0xff]  ;;  %v58_v11 = vld [vmem:[%s2826_s0 + $0x98] sm:$0xff] }
   0x4   :  { %v79_v8 = vpack.c.bf16 %v56_v5, %v55_v3  ;;  %v43_v12 = vld [vmem:[%s2826_s0 + $0x20] sm:$0xff]  ;;  %v80_v13 = vpack.c.bf16 %v58_v11, %v57_v10  ;;  %v44_v14 = vld [vmem:[%s2826_s0 + $0x28] sm:$0xff]  ;;  %v45_v19 = vld [vmem:[%s2826_s0 + $0x30] sm:$0xff] }
   0x5   :  { %1772 = vmatprep.mubr.msk.bf16.mxu0 %vm102_vm0, %v71_v4  ;;  %v59_v15 = vld [vmem:[%s2826_s0 + $0xa0] sm:$0xff]  ;;  %v60_v16 = vld [vmem:[%s2826_s0 + $0xa8] sm:$0xff]  ;;  %v73_v17 = vpack.c.bf16 %v44_v14, %v43_v12  ;;  %v46_v20 = vld [vmem:[%s2826_s0 + $0x38] sm:$0xff] }
   0x6   :  { %1790 = vmatprep.mubr.msk.bf16.mxu1 %vm102_vm0, %v79_v8  ;;  %v81_v18 = vpack.c.bf16 %v60_v16, %v59_v15  ;;  %1773 = vmatmul.mubr.msk.bf16.vlgmr.msra.gmra.mrb[0].mxu0 %vm102_vm0, %v72_v9  ;;  %v61_v21 = vld [vmem:[%s2826_s0 + $0xb0] sm:$0xff]  ;;  %v62_v22 = vld [vmem:[%s2826_s0 + $0xb8] sm:$0xff]  ;;  %v47_v23 = vld [vmem:[%s2826_s0 + $0x40] sm:$0xff]  ;;  %v74_v27 = vpack.c.bf16 %v46_v20, %v45_v19 }
   0x7   :  { %1791 = vmatmul.mubr.msk.bf16.vlgmr.msra.gmra.mrb[0].mxu1 %vm102_vm0, %v80_v13  ;;  %1776 = vmatprep.mubr.msk.bf16.mxu0 %vm102_vm0, %v73_v17  ;;  %v48_v24 = vld [vmem:[%s2826_s0 + $0x48] sm:$0xff]  ;;  %v63_v25 = vld [vmem:[%s2826_s0 + $0xc0] sm:$0xff]  ;;  %v82_v28 = vpack.c.bf16 %v62_v22, %v61_v21  ;;  %v49_v32 = vld [vmem:[%s2826_s0 + $0x50] sm:$0xff] }
   0x8   :  { %1794 = vmatprep.mubr.msk.bf16.mxu1 %vm102_vm0, %v81_v18  ;;  %v64_v26 = vld [vmem:[%s2826_s0 + $0xc8] sm:$0xff]  ;;  %v75_v29 = vpack.c.bf16 %v48_v24, %v47_v23  ;;  %v2063_v31 = vld [vmem:[%s2827_s3] sm:$0xff]   ;;  %v50_v33 = vld [vmem:[%s2826_s0 + $0x58] sm:$0xff] }
   0x9   :  { %v83_v30 = vpack.c.bf16 %v64_v26, %v63_v25  ;;  %v65_v34 = vld [vmem:[%s2826_s0 + $0xd0] sm:$0xff]  ;;  %v66_v35 = vld [vmem:[%s2826_s0 + $0xd8] sm:$0xff]  ;;  %v51_v36 = vld [vmem:[%s2826_s0 + $0x60] sm:$0xff]  ;;  %1806 = vmatprep.subr.bf16.mxu0 %v2063_v31  ;;  %1838 = vmatprep.subr.bf16.mxu1 %v2063_v31  ;;  %v76_v41 = vpack.c.bf16 %v50_v33, %v49_v32 }
   0xa   :  { %v52_v37 = vld [vmem:[%s2826_s0 + $0x68] sm:$0xff]  ;;  %v67_v38 = vld [vmem:[%s2826_s0 + $0xe0] sm:$0xff]  ;;  %1807 = vmatpush3.bf16.msra.mxu0 %v2063_v31  ;;  %1839 = vmatpush3.bf16.msra.mxu1 %v2063_v31  ;;  %v84_v42 = vpack.c.bf16 %v66_v35, %v65_v34  ;;  %v2065_v45 = vld [vmem:[%s2827_s3 + $0x10] sm:$0xff]  }
   0xb   :  { %v68_v39 = vld [vmem:[%s2826_s0 + $0xe8] sm:$0xff]  ;;  %v77_v43 = vpack.c.bf16 %v52_v37, %v51_v36  ;;  %v53_v46 = vld [vmem:[%s2826_s0 + $0x70] sm:$0xff]  ;;  %v54_v47 = vld [vmem:[%s2826_s0 + $0x78] sm:$0xff] }
   0xc   :  { %v2064_v40 = vld [vmem:[%s2827_s3 + $0x8] sm:$0xff]   ;;  %v85_v44 = vpack.c.bf16 %v68_v39, %v67_v38  ;;  %v69_v48 = vld [vmem:[%s2826_s0 + $0xf0] sm:$0xff]  ;;  %v70_v49 = vld [vmem:[%s2826_s0 + $0xf8] sm:$0xff]  ;;  %v78_v50 = vpack.c.bf16 %v54_v47, %v53_v46 }
   0xd   :  { %1808 = vmatprep.subr.bf16.mxu0 %v2064_v40  ;;  %1840 = vmatprep.subr.bf16.mxu1 %v2064_v40  ;;  %v86_v51 = vpack.c.bf16 %v70_v49, %v69_v48  ;;  %v2066_v52 = vld [vmem:[%s2827_s3 + $0x18] sm:$0xff]   ;;  %v2067_v53 = vld [vmem:[%s2827_s3 + $0x20] sm:$0xff]   ;;  %v2068_v54 = vld [vmem:[%s2827_s3 + $0x28] sm:$0xff]  }
   0xe   :  { %1777 = vmatmul.mubr.msk.bf16.gmra.mrb[4].mxu0 %vm102_vm0, %v74_v27  ;;  %1841 = vmatpush3.bf16.msra.mxu1 %v2064_v40  ;;  %v2069_v55 = vld [vmem:[%s2827_s3 + $0x30] sm:$0xff]   ;;  %v2070_v56 = vld [vmem:[%s2827_s3 + $0x38] sm:$0xff]   ;;  %v2425_v57 = vld [vmem:[%s2828_s5] sm:$0xff]  }
   0xf   :  { %1795 = vmatmul.mubr.msk.bf16.gmra.mrb[4].mxu1 %vm102_vm0, %v82_v28  ;;  %1780 = vmatprep.mubr.msk.bf16.mxu0 %vm102_vm0, %v75_v29  ;;  %v2432_v59 = vld [vmem:[%s2829_s2] ss:$0 sm:$0xff] }
  0x10   :  { %1798 = vmatprep.mubr.msk.bf16.mxu1 %vm102_vm0, %v83_v30  ;;  %1809 = vmatpush3.bf16.msra.mxu0 %v2064_v40 }
  0x11   :  { %1810 = vmatprep.subr.bf16.mxu0 %v2065_v45  ;;  %1842 = vmatprep.subr.bf16.mxu1 %v2065_v45 }
  0x12   :  { %1843 = vmatpush3.bf16.msra.mxu1 %v2065_v45 }
  0x13   :  { %1844 = vmatprep.subr.bf16.mxu1 %v2066_v52 }
  0x14   :  { %1811 = vmatpush3.bf16.msra.mxu0 %v2065_v45 }
  0x15   :  { %1812 = vmatprep.subr.bf16.mxu0 %v2066_v52 }
  0x16   :  { %1781 = vmatmul.mubr.msk.bf16.gmra.mrb[8].mxu0 %vm102_vm0, %v76_v41  ;;  %1845 = vmatpush3.bf16.msra.mxu1 %v2066_v52 }
  0x17   :  { %1799 = vmatmul.mubr.msk.bf16.gmra.mrb[8].mxu1 %vm102_vm0, %v84_v42  ;;  %1784 = vmatprep.mubr.msk.bf16.mxu0 %vm102_vm0, %v77_v43 }
  0x18   :  { %1802 = vmatprep.mubr.msk.bf16.mxu1 %vm102_vm0, %v85_v44  ;;  %1813 = vmatpush3.bf16.msra.mxu0 %v2066_v52 }
  0x19   :  { %1814 = vmatprep.subr.bf16.mxu0 %v2067_v53  ;;  %1846 = vmatprep.subr.bf16.mxu1 %v2067_v53 }
  0x1a   :  { %1847 = vmatpush3.bf16.msra.mxu1 %v2067_v53 }
  0x1b   :  { %1848 = vmatprep.subr.bf16.mxu1 %v2068_v54 }
  0x1c   :  { %1815 = vmatpush3.bf16.msra.mxu0 %v2067_v53 }
  0x1d   :  { %1816 = vmatprep.subr.bf16.mxu0 %v2068_v54 }
  0x1e   :  { %1785 = vmatmul.mubr.msk.bf16.gmra.mrb[12].mxu0 %vm102_vm0, %v78_v50  ;;  %1849 = vmatpush3.bf16.msra.mxu1 %v2068_v54 }
  0x1f   :  { %1803 = vmatmul.mubr.msk.bf16.gmra.mrb[12].mxu1 %vm102_vm0, %v86_v51  ;;  %1850 = vmatprep.subr.bf16.mxu1 %v2069_v55 }
  0x20   :  { %1817 = vmatpush3.bf16.msra.mxu0 %v2068_v54  ;;  %v2072_v54 = vld [vmem:[%s2828_s5 + $0x8] sm:$0xff]  }
  0x21   :  { %1818 = vmatprep.subr.bf16.mxu0 %v2069_v55 }
  0x22   :  { %1851 = vmatpush3.bf16.msra.mxu1 %v2069_v55 }
  0x23   :  { %1852 = vmatprep.subr.bf16.mxu1 %v2070_v56 }
  0x24   :  { %1819 = vmatpush3.bf16.msra.mxu0 %v2069_v55 }
  0x25   :  { %1820 = vmatprep.subr.bf16.mxu0 %v2070_v56 }
  0x26   :  { %1853 = vmatpush3.bf16.msra.mxu1 %v2070_v56 }
  0x27   :  { %1902 = vmatprep.subr.bf16.mxu1 %v2425_v57 }
  0x28   :  { %1821 = vmatpush3.bf16.msra.mxu0 %v2070_v56 }
  0x29   :  { %1870 = vmatprep.subr.bf16.mxu0 %v2425_v57 }
  0xd9   :  { %v1774_v58 = vpop.f32.mrb[0].mxu0 }
  0xda   :  { %v1792_v60 = vpop.f32.mrb[0].mxu1  ;;  %v161_v61 = vpop.f32.mrb[1].mxu0  ;;  %v170_v1 = vadd.f32 %v1774_v58, %v2432_v59 }
  0xdb   :  { %v282_v62 = vpop.f32.mrb[1].mxu1  ;;  %v1775_v63 = vpop.f32.mrb[2].mxu0  ;;  %v291_v2 = vadd.f32 %v1792_v60, %v2432_v59  ;;  %v162_v7 = vadd.f32 %v2432_v59, %v161_v61 }
  0xdc   :  { %v1793_v0 = vpop.f32.mrb[2].mxu1  ;;  %v173_v3 = vadd.f32 %v1775_v63, %v2432_v59  ;;  %v164_v5 = vpop.f32.mrb[3].mxu0  ;;  %v283_v8 = vadd.f32 %v2432_v59, %v282_v62 }
  0xdd   :  { %v294_v4 = vadd.f32 %v1793_v0, %v2432_v59  ;;  %v285_v6 = vpop.f32.mrb[3].mxu1  ;;  %v165_v9 = vadd.f32 %v2432_v59, %v164_v5  ;;  %v2073_v0 = vld [vmem:[%s2828_s5 + $0x10] sm:$0xff]  }
  0xde   :  { %v286_v10 = vadd.f32 %v2432_v59, %v285_v6  ;;  %v346_v11 = vpack.c.bf16 %v173_v3, %v170_v1 }
  0xdf   :  { %v362_v12 = vpack.c.bf16 %v294_v4, %v291_v2  ;;  %v345_v13 = vpack.c.bf16 %v165_v9, %v162_v7 }
  0xe0   :  { %v361_v14 = vpack.c.bf16 %v286_v10, %v283_v8  ;;  %2095 = vtanh.bf16 %v346_v11 }
  0xe1   :  { %2097 = vtanh.bf16 %v362_v12  ;;  %v1778_v15 = vpop.f32.mrb[4].mxu0 }
  0xe2   :  { %v1796_v16 = vpop.f32.mrb[4].mxu1  ;;  %2099 = vtanh.bf16 %v345_v13  ;;  %v177_v17 = vpop.f32.mrb[5].mxu0  ;;  %v186_v21 = vadd.f32 %v1778_v15, %v2432_v59 }
  0xe3   :  { %v298_v18 = vpop.f32.mrb[5].mxu1  ;;  %2101 = vtanh.bf16 %v361_v14  ;;  %v1779_v19 = vpop.f32.mrb[6].mxu0  ;;  %v307_v22 = vadd.f32 %v1796_v16, %v2432_v59  ;;  %v178_v27 = vadd.f32 %v2432_v59, %v177_v17 }
  0xe4   :  { %v1797_v20 = vpop.f32.mrb[6].mxu1  ;;  %v189_v23 = vadd.f32 %v1779_v19, %v2432_v59  ;;  %v180_v25 = vpop.f32.mrb[7].mxu0  ;;  %v299_v28 = vadd.f32 %v2432_v59, %v298_v18 }
  0xe5   :  { %v310_v24 = vadd.f32 %v1797_v20, %v2432_v59  ;;  %v301_v26 = vpop.f32.mrb[7].mxu1  ;;  %v181_v29 = vadd.f32 %v2432_v59, %v180_v25 }
  0xe6   :  { %v302_v30 = vadd.f32 %v2432_v59, %v301_v26  ;;  %v348_v31 = vpack.c.bf16 %v189_v23, %v186_v21 }
  0xe7   :  { %v364_v32 = vpack.c.bf16 %v310_v24, %v307_v22  ;;  %v347_v33 = vpack.c.bf16 %v181_v29, %v178_v27  ;;  %v2074_v29 = vld [vmem:[%s2828_s5 + $0x18] sm:$0xff]  }
  0xe8   :  { %v363_v34 = vpack.c.bf16 %v302_v30, %v299_v28  ;;  %2103 = vtanh.bf16 %v348_v31  ;;  %v2075_v30 = vld [vmem:[%s2828_s5 + $0x20] sm:$0xff]   ;;  %v2076_v31 = vld [vmem:[%s2828_s5 + $0x28] sm:$0xff]  }
  0xe9   :  { %2105 = vtanh.bf16 %v364_v32  ;;  %v1782_v35 = vpop.f32.mrb[8].mxu0  ;;  %v2077_v32 = vld [vmem:[%s2828_s5 + $0x30] sm:$0xff]  }
  0xea   :  { %v1800_v36 = vpop.f32.mrb[8].mxu1  ;;  %2107 = vtanh.bf16 %v347_v33  ;;  %v193_v37 = vpop.f32.mrb[9].mxu0  ;;  %v202_v43 = vadd.f32 %v1782_v35, %v2432_v59  ;;  %v2078_v33 = vld [vmem:[%s2828_s5 + $0x38] sm:$0xff]  }
  0xeb   :  { %v314_v38 = vpop.f32.mrb[9].mxu1  ;;  %v2096_v39 = vpop.eup %2095  ;;  %2109 = vtanh.bf16 %v363_v34  ;;  %v323_v44 = vadd.f32 %v1800_v36, %v2432_v59  ;;  %v194_v50 = vadd.f32 %v2432_v59, %v193_v37  ;;  %v2492_v34 = vld [vmem:[%s2830_s7] sm:$0xff]  }
  0xec   :  { %v1783_v40 = vpop.f32.mrb[10].mxu0  ;;  %v1801_v41 = vpop.f32.mrb[10].mxu1  ;;  %v315_v51 = vadd.f32 %v2432_v59, %v314_v38  ;;  %v2499_v36 = vld [vmem:[%s2831_s4] ss:$0 sm:$0xff] }
  0xed   :  { %v2098_v42 = vpop.eup %2097  ;;  %v205_v45 = vadd.f32 %v1783_v40, %v2432_v59  ;;  %v326_v46 = vadd.f32 %v1801_v41, %v2432_v59  ;;  %v196_v47 = vpop.f32.mrb[11].mxu0 }
  0xee   :  { %v317_v48 = vpop.f32.mrb[11].mxu1  ;;  %v2100_v49 = vpop.eup %2099  ;;  %v197_v52 = vadd.f32 %v2432_v59, %v196_v47 }
  0xef   :  { %v318_v53 = vadd.f32 %v2432_v59, %v317_v48  ;;  %v2102_v55 = vpop.eup %2101  ;;  %v350_v56 = vpack.c.bf16 %v205_v45, %v202_v43  ;;  %v366_v58 = vpack.c.bf16 %v326_v46, %v323_v44  ;;  %1822 = vmatprep.mubr.bf16.mxu0 %v2100_v49 }
  0xf0   :  { %v349_v60 = vpack.c.bf16 %v197_v52, %v194_v50  ;;  %1854 = vmatprep.mubr.bf16.mxu1 %v2102_v55  ;;  %1823 = vmatmul.mubr.bf16.vlgmr.msra.gmra.mrb[16].mxu0 %v2096_v39 }
  0xf1   :  { %v365_v61 = vpack.c.bf16 %v318_v53, %v315_v51  ;;  %2111 = vtanh.bf16 %v350_v56  ;;  %1855 = vmatmul.mubr.bf16.vlgmr.msra.gmra.mrb[16].mxu1 %v2098_v42  ;;  %1871 = vmatpush3.bf16.msra.mxu0 %v2425_v57  ;;  %v1786_v62 = vpop.f32.mrb[12].mxu0 }
  0xf2   :  { %2113 = vtanh.bf16 %v366_v58  ;;  %v1804_v63 = vpop.f32.mrb[12].mxu1  ;;  %1903 = vmatpush3.bf16.msra.mxu1 %v2425_v57  ;;  %1872 = vmatprep.subr.bf16.mxu0 %v2072_v54  ;;  %v209_v1 = vpop.f32.mrb[13].mxu0  ;;  %v218_v4 = vadd.f32 %v1786_v62, %v2432_v59 }
  0xf3   :  { %2115 = vtanh.bf16 %v349_v60  ;;  %v330_v2 = vpop.f32.mrb[13].mxu1  ;;  %1904 = vmatprep.subr.bf16.mxu1 %v2072_v54  ;;  %v2104_v3 = vpop.eup %2103  ;;  %v339_v8 = vadd.f32 %v1804_v63, %v2432_v59  ;;  %v210_v57 = vadd.f32 %v2432_v59, %v209_v1 }
  0xf4   :  { %2117 = vtanh.bf16 %v365_v61  ;;  %v1787_v5 = vpop.f32.mrb[14].mxu0  ;;  %v1805_v6 = vpop.f32.mrb[14].mxu1  ;;  %v331_v14 = vadd.f32 %v2432_v59, %v330_v2 }
  0xf5   :  { %v2106_v7 = vpop.eup %2105  ;;  %v221_v9 = vadd.f32 %v1787_v5, %v2432_v59  ;;  %v342_v10 = vadd.f32 %v1805_v6, %v2432_v59  ;;  %v212_v11 = vpop.f32.mrb[15].mxu0  ;;  %1873 = vmatpush3.bf16.msra.mxu0 %v2072_v54 }
  0xf6   :  { %v333_v12 = vpop.f32.mrb[15].mxu1  ;;  %v2108_v13 = vpop.eup %2107  ;;  %v213_v15 = vadd.f32 %v2432_v59, %v212_v11  ;;  %1905 = vmatpush3.bf16.msra.mxu1 %v2072_v54  ;;  %1874 = vmatprep.subr.bf16.mxu0 %v2073_v0 }
  0xf7   :  { %v334_v16 = vadd.f32 %v2432_v59, %v333_v12  ;;  %v2110_v17 = vpop.eup %2109  ;;  %v352_v18 = vpack.c.bf16 %v221_v9, %v218_v4  ;;  %v368_v19 = vpack.c.bf16 %v342_v10, %v339_v8  ;;  %1826 = vmatprep.mubr.bf16.mxu0 %v2108_v13  ;;  %1906 = vmatprep.subr.bf16.mxu1 %v2073_v0 }
  0xf8   :  { %v351_v20 = vpack.c.bf16 %v213_v15, %v210_v57  ;;  %1858 = vmatprep.mubr.bf16.mxu1 %v2110_v17  ;;  %1827 = vmatmul.mubr.bf16.gmra.mrb[20].mxu0 %v2104_v3 }
  0xf9   :  { %v367_v21 = vpack.c.bf16 %v334_v16, %v331_v14  ;;  %1859 = vmatmul.mubr.bf16.gmra.mrb[20].mxu1 %v2106_v7  ;;  %1875 = vmatpush3.bf16.msra.mxu0 %v2073_v0  ;;  %2119 = vtanh.bf16 %v352_v18 }
  0xfa   :  { %1907 = vmatpush3.bf16.msra.mxu1 %v2073_v0  ;;  %2121 = vtanh.bf16 %v351_v20  ;;  %1876 = vmatprep.subr.bf16.mxu0 %v2074_v29 }
  0xfb   :  { %2123 = vtanh.bf16 %v367_v21  ;;  %1908 = vmatprep.subr.bf16.mxu1 %v2074_v29 }
  0xfc   :  { %v2112_v22 = vpop.eup %2111  ;;  %2125 = vtanh.bf16 %v368_v19 }
  0xfd   :  { %v2114_v23 = vpop.eup %2113  ;;  %1877 = vmatpush3.bf16.msra.mxu0 %v2074_v29 }
  0xfe   :  { %v2116_v59 = vpop.eup %2115  ;;  %1909 = vmatpush3.bf16.msra.mxu1 %v2074_v29  ;;  %1878 = vmatprep.subr.bf16.mxu0 %v2075_v30 }
  0xff   :  { %v2118_v24 = vpop.eup %2117  ;;  %1830 = vmatprep.mubr.bf16.mxu0 %v2116_v59  ;;  %1910 = vmatprep.subr.bf16.mxu1 %v2075_v30 }
 0x100   :  { %1862 = vmatprep.mubr.bf16.mxu1 %v2118_v24  ;;  %1831 = vmatmul.mubr.bf16.gmra.mrb[24].mxu0 %v2112_v22 }
 0x101   :  { %1863 = vmatmul.mubr.bf16.gmra.mrb[24].mxu1 %v2114_v23  ;;  %1879 = vmatpush3.bf16.msra.mxu0 %v2075_v30 }
 0x102   :  { %1911 = vmatpush3.bf16.msra.mxu1 %v2075_v30  ;;  %1880 = vmatprep.subr.bf16.mxu0 %v2076_v31 }
 0x103   :  { %1912 = vmatprep.subr.bf16.mxu1 %v2076_v31 }
 0x104   :  { %v2120_v25 = vpop.eup %2119 }
 0x105   :  { %v2122_v26 = vpop.eup %2121  ;;  %1881 = vmatpush3.bf16.msra.mxu0 %v2076_v31 }
 0x106   :  { %v2124_v27 = vpop.eup %2123  ;;  %1834 = vmatprep.mubr.bf16.mxu0 %v2122_v26  ;;  %1913 = vmatpush3.bf16.msra.mxu1 %v2076_v31 }
 0x107   :  { %v2126_v28 = vpop.eup %2125  ;;  %1866 = vmatprep.mubr.bf16.mxu1 %v2124_v27  ;;  %1882 = vmatprep.subr.bf16.mxu0 %v2077_v32 }
 0x108   :  { %1835 = vmatmul.mubr.bf16.gmra.mrb[28].mxu0 %v2120_v25  ;;  %1914 = vmatprep.subr.bf16.mxu1 %v2077_v32 }
 0x109   :  { %1867 = vmatmul.mubr.bf16.gmra.mrb[28].mxu1 %v2126_v28  ;;  %1883 = vmatpush3.bf16.msra.mxu0 %v2077_v32  ;;  %v2080_v28 = vld [vmem:[%s2830_s7 + $0x8] sm:$0xff]  }
 0x10a   :  { %1915 = vmatpush3.bf16.msra.mxu1 %v2077_v32  ;;  %1884 = vmatprep.subr.bf16.mxu0 %v2078_v33 }
 0x10b   :  { %1916 = vmatprep.subr.bf16.mxu1 %v2078_v33 }
 0x10d   :  { %1885 = vmatpush3.bf16.msra.mxu0 %v2078_v33 }
 0x10e   :  { %1917 = vmatpush3.bf16.msra.mxu1 %v2078_v33  ;;  %1934 = vmatprep.subr.bf16.mxu0 %v2492_v34 }
 0x10f   :  { %1966 = vmatprep.subr.bf16.mxu1 %v2492_v34 }
 0x1c3   :  { %v1824_v35 = vpop.f32.mrb[16].mxu0 }
 0x1c4   :  { %v1856_v37 = vpop.f32.mrb[16].mxu1  ;;  %v482_v38 = vpop.f32.mrb[17].mxu0  ;;  %v491_v41 = vadd.f32 %v1824_v35, %v2499_v36 }
 0x1c5   :  { %v579_v39 = vpop.f32.mrb[17].mxu1  ;;  %v1825_v40 = vpop.f32.mrb[18].mxu0  ;;  %v588_v45 = vadd.f32 %v1856_v37, %v2499_v36  ;;  %v483_v46 = vadd.f32 %v2499_v36, %v482_v38 }
 0x1c6   :  { %v494_v42 = vadd.f32 %v1825_v40, %v2499_v36  ;;  %v1857_v43 = vpop.f32.mrb[18].mxu1  ;;  %v485_v44 = vpop.f32.mrb[19].mxu0  ;;  %v580_v50 = vadd.f32 %v2499_v36, %v579_v39  ;;  %v2081_v40 = vld [vmem:[%s2830_s7 + $0x10] sm:$0xff]  }
 0x1c7   :  { %v591_v47 = vadd.f32 %v1857_v43, %v2499_v36  ;;  %v486_v48 = vadd.f32 %v2499_v36, %v485_v44  ;;  %v582_v49 = vpop.f32.mrb[19].mxu1 }
 0x1c8   :  { %v643_v51 = vpack.c.bf16 %v494_v42, %v491_v41  ;;  %v583_v52 = vadd.f32 %v2499_v36, %v582_v49 }
 0x1c9   :  { %v659_v53 = vpack.c.bf16 %v591_v47, %v588_v45  ;;  %v642_v54 = vpack.c.bf16 %v486_v48, %v483_v46 }
 0x1ca   :  { %v658_v55 = vpack.c.bf16 %v583_v52, %v580_v50  ;;  %2127 = vtanh.bf16 %v643_v51 }
 0x1cb   :  { %v1828_v56 = vpop.f32.mrb[20].mxu0  ;;  %2129 = vtanh.bf16 %v642_v54 }
 0x1cc   :  { %v1860_v58 = vpop.f32.mrb[20].mxu1  ;;  %v498_v60 = vpop.f32.mrb[21].mxu0  ;;  %2131 = vtanh.bf16 %v658_v55  ;;  %v507_v63 = vadd.f32 %v1828_v56, %v2499_v36 }
 0x1cd   :  { %v595_v61 = vpop.f32.mrb[21].mxu1  ;;  %v1829_v62 = vpop.f32.mrb[22].mxu0  ;;  %2133 = vtanh.bf16 %v659_v53  ;;  %v604_v3 = vadd.f32 %v1860_v58, %v2499_v36  ;;  %v499_v4 = vadd.f32 %v2499_v36, %v498_v60 }
 0x1ce   :  { %v510_v0 = vadd.f32 %v1829_v62, %v2499_v36  ;;  %v1861_v1 = vpop.f32.mrb[22].mxu1  ;;  %v501_v2 = vpop.f32.mrb[23].mxu0  ;;  %v596_v8 = vadd.f32 %v2499_v36, %v595_v61 }
 0x1cf   :  { %v607_v5 = vadd.f32 %v1861_v1, %v2499_v36  ;;  %v502_v6 = vadd.f32 %v2499_v36, %v501_v2  ;;  %v598_v7 = vpop.f32.mrb[23].mxu1 }
 0x1d0   :  { %v645_v57 = vpack.c.bf16 %v510_v0, %v507_v63  ;;  %v599_v9 = vadd.f32 %v2499_v36, %v598_v7 }
 0x1d1   :  { %v661_v10 = vpack.c.bf16 %v607_v5, %v604_v3  ;;  %v644_v11 = vpack.c.bf16 %v502_v6, %v499_v4 }
 0x1d2   :  { %v660_v12 = vpack.c.bf16 %v599_v9, %v596_v8  ;;  %2135 = vtanh.bf16 %v645_v57  ;;  %v2082_v8 = vld [vmem:[%s2830_s7 + $0x18] sm:$0xff]   ;;  %v2083_v57 = vld [vmem:[%s2830_s7 + $0x20] sm:$0xff]   ;;  %v2084_v9 = vld [vmem:[%s2830_s7 + $0x28] sm:$0xff]  }
 0x1d3   :  { %v1832_v13 = vpop.f32.mrb[24].mxu0  ;;  %2137 = vtanh.bf16 %v644_v11  ;;  %v2086_v11 = vld [vmem:[%s2830_s7 + $0x38] sm:$0xff]  }
 0x1d4   :  { %v1864_v14 = vpop.f32.mrb[24].mxu1  ;;  %v514_v15 = vpop.f32.mrb[25].mxu0  ;;  %2139 = vtanh.bf16 %v660_v12  ;;  %v523_v19 = vadd.f32 %v1832_v13, %v2499_v36  ;;  %v2559_v12 = vld [vmem:[%s2832_s9] sm:$0xff]  }
 0x1d5   :  { %v611_v16 = vpop.f32.mrb[25].mxu1  ;;  %v1833_v17 = vpop.f32.mrb[26].mxu0  ;;  %2141 = vtanh.bf16 %v661_v10  ;;  %v620_v59 = vadd.f32 %v1864_v14, %v2499_v36  ;;  %v515_v24 = vadd.f32 %v2499_v36, %v514_v15  ;;  %v2085_v10 = vld [vmem:[%s2830_s7 + $0x30] sm:$0xff]   ;;  %v2566_v14 = vld [vmem:[%s2833_s6] ss:$0 sm:$0xff] }
 0x1d6   :  { %v2128_v18 = vpop.eup %2127  ;;  %v526_v20 = vadd.f32 %v1833_v17, %v2499_v36  ;;  %v1865_v21 = vpop.f32.mrb[26].mxu1  ;;  %v612_v30 = vadd.f32 %v2499_v36, %v611_v16 }
 0x1d7   :  { %v517_v22 = vpop.f32.mrb[27].mxu0  ;;  %v2130_v23 = vpop.eup %2129  ;;  %v623_v25 = vadd.f32 %v1865_v21, %v2499_v36 }
 0x1d8   :  { %v518_v26 = vadd.f32 %v2499_v36, %v517_v22  ;;  %v614_v27 = vpop.f32.mrb[27].mxu1  ;;  %v2132_v29 = vpop.eup %2131  ;;  %v647_v31 = vpack.c.bf16 %v526_v20, %v523_v19  ;;  %1886 = vmatprep.mubr.bf16.mxu0 %v2130_v23 }
 0x1d9   :  { %v615_v32 = vadd.f32 %v2499_v36, %v614_v27  ;;  %v2134_v33 = vpop.eup %2133  ;;  %v663_v35 = vpack.c.bf16 %v623_v25, %v620_v59  ;;  %1918 = vmatprep.mubr.bf16.mxu1 %v2132_v29  ;;  %1887 = vmatmul.mubr.bf16.vlgmr.msra.gmra.mrb[32].mxu0 %v2128_v18 }
 0x1da   :  { %v646_v37 = vpack.c.bf16 %v518_v26, %v515_v24  ;;  %1919 = vmatmul.mubr.bf16.vlgmr.msra.gmra.mrb[32].mxu1 %v2134_v33  ;;  %1935 = vmatpush3.bf16.msra.mxu0 %v2492_v34  ;;  %2143 = vtanh.bf16 %v647_v31 }
 0x1db   :  { %v662_v38 = vpack.c.bf16 %v615_v32, %v612_v30  ;;  %v1836_v39 = vpop.f32.mrb[28].mxu0  ;;  %1967 = vmatpush3.bf16.msra.mxu1 %v2492_v34  ;;  %1936 = vmatprep.subr.bf16.mxu0 %v2080_v28 }
 0x1dc   :  { %2145 = vtanh.bf16 %v646_v37  ;;  %v1868_v41 = vpop.f32.mrb[28].mxu1  ;;  %v530_v42 = vpop.f32.mrb[29].mxu0  ;;  %1968 = vmatprep.subr.bf16.mxu1 %v2080_v28  ;;  %v539_v46 = vadd.f32 %v1836_v39, %v2499_v36 }
 0x1dd   :  { %2147 = vtanh.bf16 %v662_v38  ;;  %v627_v43 = vpop.f32.mrb[29].mxu1  ;;  %v1837_v44 = vpop.f32.mrb[30].mxu0  ;;  %v636_v47 = vadd.f32 %v1868_v41, %v2499_v36  ;;  %v531_v51 = vadd.f32 %v2499_v36, %v530_v42 }
 0x1de   :  { %v2136_v45 = vpop.eup %2135  ;;  %2149 = vtanh.bf16 %v663_v35  ;;  %v542_v34 = vadd.f32 %v1837_v44, %v2499_v36  ;;  %v1869_v48 = vpop.f32.mrb[30].mxu1  ;;  %1937 = vmatpush3.bf16.msra.mxu0 %v2080_v28  ;;  %v628_v56 = vadd.f32 %v2499_v36, %v627_v43 }
 0x1df   :  { %v533_v49 = vpop.f32.mrb[31].mxu0  ;;  %v2138_v50 = vpop.eup %2137  ;;  %v639_v52 = vadd.f32 %v1869_v48, %v2499_v36  ;;  %1969 = vmatpush3.bf16.msra.mxu1 %v2080_v28  ;;  %1938 = vmatprep.subr.bf16.mxu0 %v2081_v40 }
 0x1e0   :  { %v534_v53 = vadd.f32 %v2499_v36, %v533_v49  ;;  %v630_v54 = vpop.f32.mrb[31].mxu1  ;;  %v2140_v55 = vpop.eup %2139  ;;  %v649_v58 = vpack.c.bf16 %v542_v34, %v539_v46  ;;  %1890 = vmatprep.mubr.bf16.mxu0 %v2138_v50  ;;  %1970 = vmatprep.subr.bf16.mxu1 %v2081_v40 }
 0x1e1   :  { %v631_v60 = vadd.f32 %v2499_v36, %v630_v54  ;;  %v2142_v61 = vpop.eup %2141  ;;  %v665_v62 = vpack.c.bf16 %v639_v52, %v636_v47  ;;  %1922 = vmatprep.mubr.bf16.mxu1 %v2140_v55  ;;  %1891 = vmatmul.mubr.bf16.gmra.mrb[36].mxu0 %v2136_v45 }
 0x1e2   :  { %v648_v63 = vpack.c.bf16 %v534_v53, %v531_v51  ;;  %1923 = vmatmul.mubr.bf16.gmra.mrb[36].mxu1 %v2142_v61  ;;  %1939 = vmatpush3.bf16.msra.mxu0 %v2081_v40  ;;  %2151 = vtanh.bf16 %v649_v58 }
 0x1e3   :  { %v664_v0 = vpack.c.bf16 %v631_v60, %v628_v56  ;;  %1971 = vmatpush3.bf16.msra.mxu1 %v2081_v40  ;;  %1940 = vmatprep.subr.bf16.mxu0 %v2082_v8 }
 0x1e4   :  { %2153 = vtanh.bf16 %v648_v63  ;;  %1972 = vmatprep.subr.bf16.mxu1 %v2082_v8 }
 0x1e5   :  { %2155 = vtanh.bf16 %v664_v0  ;;  %v2144_v1 = vpop.eup %2143 }
 0x1e6   :  { %2157 = vtanh.bf16 %v665_v62  ;;  %1941 = vmatpush3.bf16.msra.mxu0 %v2082_v8 }
 0x1e7   :  { %v2146_v2 = vpop.eup %2145  ;;  %1973 = vmatpush3.bf16.msra.mxu1 %v2082_v8  ;;  %1942 = vmatprep.subr.bf16.mxu0 %v2083_v57 }
 0x1e8   :  { %v2148_v3 = vpop.eup %2147  ;;  %1894 = vmatprep.mubr.bf16.mxu0 %v2146_v2  ;;  %1974 = vmatprep.subr.bf16.mxu1 %v2083_v57 }
 0x1e9   :  { %v2150_v36 = vpop.eup %2149  ;;  %1926 = vmatprep.mubr.bf16.mxu1 %v2148_v3  ;;  %1895 = vmatmul.mubr.bf16.gmra.mrb[40].mxu0 %v2144_v1 }
 0x1ea   :  { %1927 = vmatmul.mubr.bf16.gmra.mrb[40].mxu1 %v2150_v36  ;;  %1943 = vmatpush3.bf16.msra.mxu0 %v2083_v57 }
 0x1eb   :  { %1975 = vmatpush3.bf16.msra.mxu1 %v2083_v57  ;;  %1944 = vmatprep.subr.bf16.mxu0 %v2084_v9 }
 0x1ec   :  { %1976 = vmatprep.subr.bf16.mxu1 %v2084_v9 }
 0x1ed   :  { %v2152_v4 = vpop.eup %2151 }
 0x1ee   :  { %1945 = vmatpush3.bf16.msra.mxu0 %v2084_v9 }
 0x1ef   :  { %v2154_v5 = vpop.eup %2153  ;;  %1977 = vmatpush3.bf16.msra.mxu1 %v2084_v9  ;;  %1946 = vmatprep.subr.bf16.mxu0 %v2085_v10 }
 0x1f0   :  { %v2156_v6 = vpop.eup %2155  ;;  %1898 = vmatprep.mubr.bf16.mxu0 %v2154_v5  ;;  %1978 = vmatprep.subr.bf16.mxu1 %v2085_v10 }
 0x1f1   :  { %v2158_v7 = vpop.eup %2157  ;;  %1930 = vmatprep.mubr.bf16.mxu1 %v2156_v6  ;;  %1899 = vmatmul.mubr.bf16.gmra.mrb[44].mxu0 %v2152_v4 }
 0x1f2   :  { %1931 = vmatmul.mubr.bf16.gmra.mrb[44].mxu1 %v2158_v7  ;;  %1947 = vmatpush3.bf16.msra.mxu0 %v2085_v10  ;;  %v2088_v7 = vld [vmem:[%s2832_s9 + $0x8] sm:$0xff]  }
 0x1f3   :  { %1979 = vmatpush3.bf16.msra.mxu1 %v2085_v10  ;;  %1948 = vmatprep.subr.bf16.mxu0 %v2086_v11 }
 0x1f4   :  { %1980 = vmatprep.subr.bf16.mxu1 %v2086_v11 }
 0x1f6   :  { %1949 = vmatpush3.bf16.msra.mxu0 %v2086_v11 }
 0x1f7   :  { %1981 = vmatpush3.bf16.msra.mxu1 %v2086_v11  ;;  %1998 = vmatprep.subr.bf16.mxu0 %v2559_v12 }
 0x1f8   :  { %2030 = vmatprep.subr.bf16.mxu1 %v2559_v12 }
 0x2ac   :  { %v1888_v13 = vpop.f32.mrb[32].mxu0 }
 0x2ad   :  { %v1920_v15 = vpop.f32.mrb[32].mxu1  ;;  %v779_v16 = vpop.f32.mrb[33].mxu0  ;;  %v788_v19 = vadd.f32 %v1888_v13, %v2566_v14 }
 0x2ae   :  { %v876_v17 = vpop.f32.mrb[33].mxu1  ;;  %v1889_v18 = vpop.f32.mrb[34].mxu0  ;;  %v885_v23 = vadd.f32 %v1920_v15, %v2566_v14  ;;  %v780_v59 = vadd.f32 %v2566_v14, %v779_v16 }
 0x2af   :  { %v791_v20 = vadd.f32 %v1889_v18, %v2566_v14  ;;  %v1921_v21 = vpop.f32.mrb[34].mxu1  ;;  %v782_v22 = vpop.f32.mrb[35].mxu0  ;;  %v877_v27 = vadd.f32 %v2566_v14, %v876_v17  ;;  %v2089_v18 = vld [vmem:[%s2832_s9 + $0x10] sm:$0xff]  }
 0x2b0   :  { %v888_v24 = vadd.f32 %v1921_v21, %v2566_v14  ;;  %v783_v25 = vadd.f32 %v2566_v14, %v782_v22  ;;  %v879_v26 = vpop.f32.mrb[35].mxu1 }
 0x2b1   :  { %v940_v28 = vpack.c.bf16 %v791_v20, %v788_v19  ;;  %v880_v29 = vadd.f32 %v2566_v14, %v879_v26 }
 0x2b2   :  { %v956_v30 = vpack.c.bf16 %v888_v24, %v885_v23  ;;  %v939_v31 = vpack.c.bf16 %v783_v25, %v780_v59 }
 0x2b3   :  { %v955_v32 = vpack.c.bf16 %v880_v29, %v877_v27  ;;  %2159 = vtanh.bf16 %v940_v28 }
 0x2b4   :  { %v1892_v33 = vpop.f32.mrb[36].mxu0  ;;  %2161 = vtanh.bf16 %v939_v31 }
 0x2b5   :  { %v1924_v35 = vpop.f32.mrb[36].mxu1  ;;  %v795_v37 = vpop.f32.mrb[37].mxu0  ;;  %2163 = vtanh.bf16 %v955_v32  ;;  %v804_v40 = vadd.f32 %v1892_v33, %v2566_v14 }
 0x2b6   :  { %v892_v38 = vpop.f32.mrb[37].mxu1  ;;  %v1893_v39 = vpop.f32.mrb[38].mxu0  ;;  %2165 = vtanh.bf16 %v956_v30  ;;  %v901_v44 = vadd.f32 %v1924_v35, %v2566_v14  ;;  %v796_v45 = vadd.f32 %v2566_v14, %v795_v37 }
 0x2b7   :  { %v807_v41 = vadd.f32 %v1893_v39, %v2566_v14  ;;  %v1925_v42 = vpop.f32.mrb[38].mxu1  ;;  %v798_v43 = vpop.f32.mrb[39].mxu0  ;;  %v893_v48 = vadd.f32 %v2566_v14, %v892_v38 }
 0x2b8   :  { %v904_v46 = vadd.f32 %v1925_v42, %v2566_v14  ;;  %v799_v47 = vadd.f32 %v2566_v14, %v798_v43  ;;  %v895_v34 = vpop.f32.mrb[39].mxu1 }
 0x2b9   :  { %v942_v49 = vpack.c.bf16 %v807_v41, %v804_v40  ;;  %v896_v50 = vadd.f32 %v2566_v14, %v895_v34 }
 0x2ba   :  { %v958_v51 = vpack.c.bf16 %v904_v46, %v901_v44  ;;  %v941_v52 = vpack.c.bf16 %v799_v47, %v796_v45 }
 0x2bb   :  { %v957_v53 = vpack.c.bf16 %v896_v50, %v893_v48  ;;  %2167 = vtanh.bf16 %v942_v49  ;;  %v2090_v48 = vld [vmem:[%s2832_s9 + $0x18] sm:$0xff]   ;;  %v2091_v49 = vld [vmem:[%s2832_s9 + $0x20] sm:$0xff]   ;;  %v2092_v50 = vld [vmem:[%s2832_s9 + $0x28] sm:$0xff]  }
 0x2bc   :  { %v1896_v54 = vpop.f32.mrb[40].mxu0  ;;  %2169 = vtanh.bf16 %v941_v52  ;;  %v2094_v52 = vld [vmem:[%s2832_s9 + $0x38] sm:$0xff]  }
 0x2bd   :  { %v1928_v55 = vpop.f32.mrb[40].mxu1  ;;  %v811_v56 = vpop.f32.mrb[41].mxu0  ;;  %2171 = vtanh.bf16 %v957_v53  ;;  %v820_v62 = vadd.f32 %v1896_v54, %v2566_v14  ;;  %v2626_v54 = vld [vmem:[%s2834_s8] ss:$0 sm:$0xff] }
 0x2be   :  { %v908_v58 = vpop.f32.mrb[41].mxu1  ;;  %v1897_v60 = vpop.f32.mrb[42].mxu0  ;;  %2173 = vtanh.bf16 %v958_v51  ;;  %v917_v3 = vadd.f32 %v1928_v55, %v2566_v14  ;;  %v812_v36 = vadd.f32 %v2566_v14, %v811_v56  ;;  %v2093_v51 = vld [vmem:[%s2832_s9 + $0x30] sm:$0xff]  }
 0x2bf   :  { %v2160_v61 = vpop.eup %2159  ;;  %v823_v63 = vadd.f32 %v1897_v60, %v2566_v14  ;;  %v1929_v0 = vpop.f32.mrb[42].mxu1  ;;  %v909_v57 = vadd.f32 %v2566_v14, %v908_v58 }
 0x2c0   :  { %v814_v1 = vpop.f32.mrb[43].mxu0  ;;  %v2162_v2 = vpop.eup %2161  ;;  %v920_v4 = vadd.f32 %v1929_v0, %v2566_v14 }
 0x2c1   :  { %v815_v5 = vadd.f32 %v2566_v14, %v814_v1  ;;  %v911_v6 = vpop.f32.mrb[43].mxu1  ;;  %v2164_v8 = vpop.eup %2163  ;;  %v944_v9 = vpack.c.bf16 %v823_v63, %v820_v62  ;;  %1950 = vmatprep.mubr.bf16.mxu0 %v2162_v2 }
 0x2c2   :  { %v912_v10 = vadd.f32 %v2566_v14, %v911_v6  ;;  %v2166_v11 = vpop.eup %2165  ;;  %v960_v13 = vpack.c.bf16 %v920_v4, %v917_v3  ;;  %1982 = vmatprep.mubr.bf16.mxu1 %v2164_v8  ;;  %1951 = vmatmul.mubr.bf16.vlgmr.msra.gmra.mrb[48].mxu0 %v2160_v61 }
 0x2c3   :  { %v943_v15 = vpack.c.bf16 %v815_v5, %v812_v36  ;;  %1983 = vmatmul.mubr.bf16.vlgmr.msra.gmra.mrb[48].mxu1 %v2166_v11  ;;  %1999 = vmatpush3.bf16.msra.mxu0 %v2559_v12  ;;  %2175 = vtanh.bf16 %v944_v9 }
 0x2c4   :  { %v959_v16 = vpack.c.bf16 %v912_v10, %v909_v57  ;;  %v1900_v17 = vpop.f32.mrb[44].mxu0  ;;  %2031 = vmatpush3.bf16.msra.mxu1 %v2559_v12  ;;  %2000 = vmatprep.subr.bf16.mxu0 %v2088_v7 }
 0x2c5   :  { %2177 = vtanh.bf16 %v943_v15  ;;  %v1932_v19 = vpop.f32.mrb[44].mxu1  ;;  %v827_v20 = vpop.f32.mrb[45].mxu0  ;;  %2032 = vmatprep.subr.bf16.mxu1 %v2088_v7  ;;  %v836_v59 = vadd.f32 %v1900_v17, %v2566_v14 }
 0x2c6   :  { %2179 = vtanh.bf16 %v959_v16  ;;  %v924_v21 = vpop.f32.mrb[45].mxu1  ;;  %v1901_v22 = vpop.f32.mrb[46].mxu0  ;;  %v933_v24 = vadd.f32 %v1932_v19, %v2566_v14  ;;  %v828_v28 = vadd.f32 %v2566_v14, %v827_v20 }
 0x2c7   :  { %v2168_v23 = vpop.eup %2167  ;;  %2181 = vtanh.bf16 %v960_v13  ;;  %v839_v12 = vadd.f32 %v1901_v22, %v2566_v14  ;;  %v1933_v25 = vpop.f32.mrb[46].mxu1  ;;  %2001 = vmatpush3.bf16.msra.mxu0 %v2088_v7  ;;  %v925_v33 = vadd.f32 %v2566_v14, %v924_v21 }
 0x2c8   :  { %v830_v26 = vpop.f32.mrb[47].mxu0  ;;  %v2170_v27 = vpop.eup %2169  ;;  %v936_v29 = vadd.f32 %v1933_v25, %v2566_v14  ;;  %2033 = vmatpush3.bf16.msra.mxu1 %v2088_v7  ;;  %2002 = vmatprep.subr.bf16.mxu0 %v2089_v18 }
 0x2c9   :  { %v831_v30 = vadd.f32 %v2566_v14, %v830_v26  ;;  %v927_v31 = vpop.f32.mrb[47].mxu1  ;;  %v2172_v32 = vpop.eup %2171  ;;  %v946_v35 = vpack.c.bf16 %v839_v12, %v836_v59  ;;  %1954 = vmatprep.mubr.bf16.mxu0 %v2170_v27  ;;  %2034 = vmatprep.subr.bf16.mxu1 %v2089_v18 }
 0x2ca   :  { %v928_v37 = vadd.f32 %v2566_v14, %v927_v31  ;;  %v2174_v38 = vpop.eup %2173  ;;  %v962_v39 = vpack.c.bf16 %v936_v29, %v933_v24  ;;  %1986 = vmatprep.mubr.bf16.mxu1 %v2172_v32  ;;  %1955 = vmatmul.mubr.bf16.gmra.mrb[52].mxu0 %v2168_v23 }
 0x2cb   :  { %v945_v40 = vpack.c.bf16 %v831_v30, %v828_v28  ;;  %1987 = vmatmul.mubr.bf16.gmra.mrb[52].mxu1 %v2174_v38  ;;  %2003 = vmatpush3.bf16.msra.mxu0 %v2089_v18  ;;  %2183 = vtanh.bf16 %v946_v35 }
 0x2cc   :  { %v961_v41 = vpack.c.bf16 %v928_v37, %v925_v33  ;;  %2035 = vmatpush3.bf16.msra.mxu1 %v2089_v18  ;;  %2004 = vmatprep.subr.bf16.mxu0 %v2090_v48 }
 0x2cd   :  { %2185 = vtanh.bf16 %v945_v40  ;;  %2036 = vmatprep.subr.bf16.mxu1 %v2090_v48 }
 0x2ce   :  { %2187 = vtanh.bf16 %v961_v41  ;;  %v2176_v42 = vpop.eup %2175 }
 0x2cf   :  { %2189 = vtanh.bf16 %v962_v39  ;;  %2005 = vmatpush3.bf16.msra.mxu0 %v2090_v48 }
 0x2d0   :  { %v2178_v43 = vpop.eup %2177  ;;  %2037 = vmatpush3.bf16.msra.mxu1 %v2090_v48  ;;  %2006 = vmatprep.subr.bf16.mxu0 %v2091_v49 }
 0x2d1   :  { %v2180_v44 = vpop.eup %2179  ;;  %1958 = vmatprep.mubr.bf16.mxu0 %v2178_v43  ;;  %2038 = vmatprep.subr.bf16.mxu1 %v2091_v49 }
 0x2d2   :  { %v2182_v14 = vpop.eup %2181  ;;  %1990 = vmatprep.mubr.bf16.mxu1 %v2180_v44  ;;  %1959 = vmatmul.mubr.bf16.gmra.mrb[56].mxu0 %v2176_v42 }
 0x2d3   :  { %1991 = vmatmul.mubr.bf16.gmra.mrb[56].mxu1 %v2182_v14  ;;  %2007 = vmatpush3.bf16.msra.mxu0 %v2091_v49 }
 0x2d4   :  { %2039 = vmatpush3.bf16.msra.mxu1 %v2091_v49  ;;  %2008 = vmatprep.subr.bf16.mxu0 %v2092_v50 }
 0x2d5   :  { %2040 = vmatprep.subr.bf16.mxu1 %v2092_v50 }
 0x2d6   :  { %v2184_v45 = vpop.eup %2183 }
 0x2d7   :  { %2009 = vmatpush3.bf16.msra.mxu0 %v2092_v50 }
 0x2d8   :  { %v2186_v46 = vpop.eup %2185  ;;  %2041 = vmatpush3.bf16.msra.mxu1 %v2092_v50  ;;  %2010 = vmatprep.subr.bf16.mxu0 %v2093_v51 }
 0x2d9   :  { %v2188_v47 = vpop.eup %2187  ;;  %1962 = vmatprep.mubr.bf16.mxu0 %v2186_v46  ;;  %2042 = vmatprep.subr.bf16.mxu1 %v2093_v51 }
 0x2da   :  { %v2190_v34 = vpop.eup %2189  ;;  %1994 = vmatprep.mubr.bf16.mxu1 %v2188_v47  ;;  %1963 = vmatmul.mubr.bf16.gmra.mrb[60].mxu0 %v2184_v45 }
 0x2db   :  { %1995 = vmatmul.mubr.bf16.gmra.mrb[60].mxu1 %v2190_v34  ;;  %2011 = vmatpush3.bf16.msra.mxu0 %v2093_v51 }
 0x2dc   :  { %2043 = vmatpush3.bf16.msra.mxu1 %v2093_v51  ;;  %2012 = vmatprep.subr.bf16.mxu0 %v2094_v52 }
 0x2dd   :  { %2044 = vmatprep.subr.bf16.mxu1 %v2094_v52 }
 0x2df   :  { %2013 = vmatpush3.bf16.msra.mxu0 %v2094_v52 }
 0x2e0   :  { %2045 = vmatpush3.bf16.msra.mxu1 %v2094_v52 }
 0x395   :  { %v1952_v53 = vpop.f32.mrb[48].mxu0 }
 0x396   :  { %v1984_v55 = vpop.f32.mrb[48].mxu1  ;;  %v1076_v56 = vpop.f32.mrb[49].mxu0  ;;  %v1085_v61 = vadd.f32 %v1952_v53, %v2626_v54 }
 0x397   :  { %v1173_v58 = vpop.f32.mrb[49].mxu1  ;;  %v1953_v60 = vpop.f32.mrb[50].mxu0  ;;  %v1182_v1 = vadd.f32 %v1984_v55, %v2626_v54  ;;  %v1077_v2 = vadd.f32 %v2626_v54, %v1076_v56 }
 0x398   :  { %v1088_v62 = vadd.f32 %v1953_v60, %v2626_v54  ;;  %v1985_v63 = vpop.f32.mrb[50].mxu1  ;;  %v1079_v0 = vpop.f32.mrb[51].mxu0  ;;  %v1174_v5 = vadd.f32 %v2626_v54, %v1173_v58 }
 0x399   :  { %v1185_v3 = vadd.f32 %v1985_v63, %v2626_v54  ;;  %v1080_v36 = vadd.f32 %v2626_v54, %v1079_v0  ;;  %v1176_v4 = vpop.f32.mrb[51].mxu1 }
 0x39a   :  { %v1237_v6 = vpack.c.bf16 %v1088_v62, %v1085_v61  ;;  %v1177_v7 = vadd.f32 %v2626_v54, %v1176_v4 }
 0x39b   :  { %v1253_v8 = vpack.c.bf16 %v1185_v3, %v1182_v1  ;;  %v1236_v57 = vpack.c.bf16 %v1080_v36, %v1077_v2 }
 0x39c   :  { %v1252_v9 = vpack.c.bf16 %v1177_v7, %v1174_v5  ;;  %2191 = vtanh.bf16 %v1237_v6 }
 0x39d   :  { %v1956_v10 = vpop.f32.mrb[52].mxu0  ;;  %2193 = vtanh.bf16 %v1236_v57 }
 0x39e   :  { %v1988_v11 = vpop.f32.mrb[52].mxu1  ;;  %v1092_v13 = vpop.f32.mrb[53].mxu0  ;;  %2195 = vtanh.bf16 %v1252_v9  ;;  %v1101_v17 = vadd.f32 %v1956_v10, %v2626_v54 }
 0x39f   :  { %v1189_v15 = vpop.f32.mrb[53].mxu1  ;;  %v1957_v16 = vpop.f32.mrb[54].mxu0  ;;  %2197 = vtanh.bf16 %v1253_v8  ;;  %v1198_v21 = vadd.f32 %v1988_v11, %v2626_v54  ;;  %v1093_v22 = vadd.f32 %v2626_v54, %v1092_v13 }
 0x3a0   :  { %v1104_v18 = vadd.f32 %v1957_v16, %v2626_v54  ;;  %v1989_v19 = vpop.f32.mrb[54].mxu1  ;;  %v1095_v20 = vpop.f32.mrb[55].mxu0  ;;  %v1190_v12 = vadd.f32 %v2626_v54, %v1189_v15 }
 0x3a1   :  { %v1201_v23 = vadd.f32 %v1989_v19, %v2626_v54  ;;  %v1096_v59 = vadd.f32 %v2626_v54, %v1095_v20  ;;  %v1192_v24 = vpop.f32.mrb[55].mxu1 }
 0x3a2   :  { %v1239_v25 = vpack.c.bf16 %v1104_v18, %v1101_v17  ;;  %v1193_v26 = vadd.f32 %v2626_v54, %v1192_v24 }
 0x3a3   :  { %v1255_v27 = vpack.c.bf16 %v1201_v23, %v1198_v21  ;;  %v1238_v28 = vpack.c.bf16 %v1096_v59, %v1093_v22  ;;  %v2663_v59 = vld [vmem:[%s2835_s10] ss:$0 sm:$0xff] }
 0x3a4   :  { %v1254_v29 = vpack.c.bf16 %v1193_v26, %v1190_v12  ;;  %2199 = vtanh.bf16 %v1239_v25 }
 0x3a5   :  { %v1960_v30 = vpop.f32.mrb[56].mxu0  ;;  %2201 = vtanh.bf16 %v1238_v28 }
 0x3a6   :  { %v1992_v31 = vpop.f32.mrb[56].mxu1  ;;  %v1108_v32 = vpop.f32.mrb[57].mxu0  ;;  %2203 = vtanh.bf16 %v1254_v29  ;;  %v1117_v38 = vadd.f32 %v1960_v30, %v2626_v54 }
 0x3a7   :  { %v1205_v33 = vpop.f32.mrb[57].mxu1  ;;  %v1961_v35 = vpop.f32.mrb[58].mxu0  ;;  %2205 = vtanh.bf16 %v1255_v27  ;;  %v1214_v43 = vadd.f32 %v1992_v31, %v2626_v54  ;;  %v1109_v44 = vadd.f32 %v2626_v54, %v1108_v32 }
 0x3a8   :  { %v2192_v37 = vpop.eup %2191  ;;  %v1120_v39 = vadd.f32 %v1961_v35, %v2626_v54  ;;  %v1993_v40 = vpop.f32.mrb[58].mxu1  ;;  %v1206_v34 = vadd.f32 %v2626_v54, %v1205_v33 }
 0x3a9   :  { %v1111_v41 = vpop.f32.mrb[59].mxu0  ;;  %v2194_v42 = vpop.eup %2193  ;;  %v1217_v14 = vadd.f32 %v1993_v40, %v2626_v54 }
 0x3aa   :  { %v1112_v45 = vadd.f32 %v2626_v54, %v1111_v41  ;;  %v1208_v46 = vpop.f32.mrb[59].mxu1  ;;  %v2196_v47 = vpop.eup %2195  ;;  %v1241_v48 = vpack.c.bf16 %v1120_v39, %v1117_v38  ;;  %2014 = vmatprep.mubr.bf16.mxu0 %v2194_v42 }
 0x3ab   :  { %v1209_v49 = vadd.f32 %v2626_v54, %v1208_v46  ;;  %v2198_v50 = vpop.eup %2197  ;;  %v1257_v51 = vpack.c.bf16 %v1217_v14, %v1214_v43  ;;  %2046 = vmatprep.mubr.bf16.mxu1 %v2196_v47  ;;  %2015 = vmatmul.mubr.bf16.vlgmr.msra.gmra.mrb[64].mxu0 %v2192_v37 }
 0x3ac   :  { %v1240_v52 = vpack.c.bf16 %v1112_v45, %v1109_v44  ;;  %2047 = vmatmul.mubr.bf16.vlgmr.msra.gmra.mrb[64].mxu1 %v2198_v50  ;;  %2207 = vtanh.bf16 %v1241_v48 }
 0x3ad   :  { %v1256_v53 = vpack.c.bf16 %v1209_v49, %v1206_v34  ;;  %v1964_v55 = vpop.f32.mrb[60].mxu0 }
 0x3ae   :  { %2209 = vtanh.bf16 %v1240_v52  ;;  %v1996_v56 = vpop.f32.mrb[60].mxu1  ;;  %v1124_v58 = vpop.f32.mrb[61].mxu0  ;;  %v1133_v63 = vadd.f32 %v1964_v55, %v2626_v54 }
 0x3af   :  { %2211 = vtanh.bf16 %v1256_v53  ;;  %v1221_v60 = vpop.f32.mrb[61].mxu1  ;;  %v1965_v61 = vpop.f32.mrb[62].mxu0  ;;  %v1230_v36 = vadd.f32 %v1996_v56, %v2626_v54  ;;  %v1125_v4 = vadd.f32 %v2626_v54, %v1124_v58 }
 0x3b0   :  { %v2200_v62 = vpop.eup %2199  ;;  %2213 = vtanh.bf16 %v1257_v51  ;;  %v1136_v0 = vadd.f32 %v1965_v61, %v2626_v54  ;;  %v1997_v1 = vpop.f32.mrb[62].mxu1  ;;  %v1222_v57 = vadd.f32 %v2626_v54, %v1221_v60 }
 0x3b1   :  { %v1127_v2 = vpop.f32.mrb[63].mxu0  ;;  %v2202_v3 = vpop.eup %2201  ;;  %v1233_v5 = vadd.f32 %v1997_v1, %v2626_v54 }
 0x3b2   :  { %v1128_v6 = vadd.f32 %v2626_v54, %v1127_v2  ;;  %v1224_v7 = vpop.f32.mrb[63].mxu1  ;;  %v2204_v8 = vpop.eup %2203  ;;  %v1243_v9 = vpack.c.bf16 %v1136_v0, %v1133_v63  ;;  %2018 = vmatprep.mubr.bf16.mxu0 %v2202_v3 }
 0x3b3   :  { %v1225_v10 = vadd.f32 %v2626_v54, %v1224_v7  ;;  %v2206_v11 = vpop.eup %2205  ;;  %v1259_v13 = vpack.c.bf16 %v1233_v5, %v1230_v36  ;;  %2050 = vmatprep.mubr.bf16.mxu1 %v2204_v8  ;;  %2019 = vmatmul.mubr.bf16.gmra.mrb[68].mxu0 %v2200_v62 }
 0x3b4   :  { %v1242_v15 = vpack.c.bf16 %v1128_v6, %v1125_v4  ;;  %2051 = vmatmul.mubr.bf16.gmra.mrb[68].mxu1 %v2206_v11  ;;  %2215 = vtanh.bf16 %v1243_v9 }
 0x3b5   :  { %v1258_v16 = vpack.c.bf16 %v1225_v10, %v1222_v57 }
 0x3b6   :  { %2217 = vtanh.bf16 %v1242_v15 }
 0x3b7   :  { %2219 = vtanh.bf16 %v1258_v16  ;;  %v2208_v17 = vpop.eup %2207 }
 0x3b8   :  { %2221 = vtanh.bf16 %v1259_v13 }
 0x3b9   :  { %v2210_v18 = vpop.eup %2209 }
 0x3ba   :  { %v2212_v19 = vpop.eup %2211  ;;  %2022 = vmatprep.mubr.bf16.mxu0 %v2210_v18 }
 0x3bb   :  { %v2214_v20 = vpop.eup %2213  ;;  %2054 = vmatprep.mubr.bf16.mxu1 %v2212_v19  ;;  %2023 = vmatmul.mubr.bf16.gmra.mrb[72].mxu0 %v2208_v17 }
 0x3bc   :  { %2055 = vmatmul.mubr.bf16.gmra.mrb[72].mxu1 %v2214_v20 }
 0x3bf   :  { %v2216_v54 = vpop.eup %2215 }
 0x3c1   :  { %v2218_v21 = vpop.eup %2217 }
 0x3c2   :  { %v2220_v22 = vpop.eup %2219  ;;  %2026 = vmatprep.mubr.bf16.mxu0 %v2218_v21 }
 0x3c3   :  { %v2222_v23 = vpop.eup %2221  ;;  %2058 = vmatprep.mubr.bf16.mxu1 %v2220_v22  ;;  %2027 = vmatmul.mubr.bf16.gmra.mrb[76].mxu0 %v2216_v54 }
 0x3c4   :  { %2059 = vmatmul.mubr.bf16.gmra.mrb[76].mxu1 %v2222_v23 }
 0x47e   :  { %v2016_v24 = vpop.f32.mrb[64].mxu0 }
 0x47f   :  { %v1382_v12 = vadd.f32 %v2016_v24, %v2663_v59  ;;  %v2048_v25 = vpop.f32.mrb[64].mxu1  ;;  %v1373_v26 = vpop.f32.mrb[65].mxu0 }
 0x480   :  { %v1479_v27 = vadd.f32 %v2048_v25, %v2663_v59  ;;  %v1374_v28 = vadd.f32 %v2663_v59, %v1373_v26  ;;  %v1470_v29 = vpop.f32.mrb[65].mxu1  ;;  %v2017_v30 = vpop.f32.mrb[66].mxu0 }
 0x481   :  { %1536 = vst.msk [vmem:[%s2836_s11 + $0x10] sm:$0xff] %vm1533_vm1, %v1382_v12  ;;  %v1471_v31 = vadd.f32 %v2663_v59, %v1470_v29  ;;  %v1385_v32 = vadd.f32 %v2017_v30, %v2663_v59  ;;  %v2049_v33 = vpop.f32.mrb[66].mxu1  ;;  %v1376_v35 = vpop.f32.mrb[67].mxu0 }
 0x482   :  { %1552 = vst.msk [vmem:[%s2836_s11 + $0x90] sm:$0xff] %vm1533_vm1, %v1479_v27  ;;  %1534 = vst.msk [vmem:[%s2836_s11] sm:$0xff] %vm1533_vm1, %v1374_v28  ;;  %v1482_v37 = vadd.f32 %v2049_v33, %v2663_v59  ;;  %v1377_v38 = vadd.f32 %v2663_v59, %v1376_v35  ;;  %v1473_v39 = vpop.f32.mrb[67].mxu1 }
 0x483   :  { %1550 = vst.msk [vmem:[%s2836_s11 + $0x80] sm:$0xff] %vm1533_vm1, %v1471_v31  ;;  %1537 = vst.msk [vmem:[%s2836_s11 + $0x18] sm:$0xff] %vm1533_vm1, %v1385_v32  ;;  %v1474_v40 = vadd.f32 %v2663_v59, %v1473_v39 }
 0x484   :  { %1553 = vst.msk [vmem:[%s2836_s11 + $0x98] sm:$0xff] %vm1533_vm1, %v1482_v37  ;;  %1535 = vst.msk [vmem:[%s2836_s11 + $0x8] sm:$0xff] %vm1533_vm1, %v1377_v38 }
 0x485   :  { %1551 = vst.msk [vmem:[%s2836_s11 + $0x88] sm:$0xff] %vm1533_vm1, %v1474_v40 }
 0x486   :  { %v2020_v41 = vpop.f32.mrb[68].mxu0 }
 0x487   :  { %v1398_v42 = vadd.f32 %v2020_v41, %v2663_v59  ;;  %v2052_v43 = vpop.f32.mrb[68].mxu1  ;;  %v1389_v44 = vpop.f32.mrb[69].mxu0 }
 0x488   :  { %v1495_v14 = vadd.f32 %v2052_v43, %v2663_v59  ;;  %v1390_v45 = vadd.f32 %v2663_v59, %v1389_v44  ;;  %v1486_v46 = vpop.f32.mrb[69].mxu1  ;;  %v2021_v47 = vpop.f32.mrb[70].mxu0 }
 0x489   :  { %1540 = vst.msk [vmem:[%s2836_s11 + $0x30] sm:$0xff] %vm1533_vm1, %v1398_v42  ;;  %v1487_v34 = vadd.f32 %v2663_v59, %v1486_v46  ;;  %v1401_v48 = vadd.f32 %v2021_v47, %v2663_v59  ;;  %v2053_v49 = vpop.f32.mrb[70].mxu1  ;;  %v1392_v50 = vpop.f32.mrb[71].mxu0 }
 0x48a   :  { %1556 = vst.msk [vmem:[%s2836_s11 + $0xb0] sm:$0xff] %vm1533_vm1, %v1495_v14  ;;  %1538 = vst.msk [vmem:[%s2836_s11 + $0x20] sm:$0xff] %vm1533_vm1, %v1390_v45  ;;  %v1498_v51 = vadd.f32 %v2053_v49, %v2663_v59  ;;  %v1393_v52 = vadd.f32 %v2663_v59, %v1392_v50  ;;  %v1489_v53 = vpop.f32.mrb[71].mxu1 }
 0x48b   :  { %1554 = vst.msk [vmem:[%s2836_s11 + $0xa0] sm:$0xff] %vm1533_vm1, %v1487_v34  ;;  %1541 = vst.msk [vmem:[%s2836_s11 + $0x38] sm:$0xff] %vm1533_vm1, %v1401_v48  ;;  %v1490_v55 = vadd.f32 %v2663_v59, %v1489_v53 }
 0x48c   :  { %1557 = vst.msk [vmem:[%s2836_s11 + $0xb8] sm:$0xff] %vm1533_vm1, %v1498_v51  ;;  %1539 = vst.msk [vmem:[%s2836_s11 + $0x28] sm:$0xff] %vm1533_vm1, %v1393_v52 }
 0x48d   :  { %1555 = vst.msk [vmem:[%s2836_s11 + $0xa8] sm:$0xff] %vm1533_vm1, %v1490_v55 }
 0x48e   :  { %v2024_v56 = vpop.f32.mrb[72].mxu0 }
 0x48f   :  { %v1414_v58 = vadd.f32 %v2024_v56, %v2663_v59  ;;  %v2056_v60 = vpop.f32.mrb[72].mxu1  ;;  %v1405_v61 = vpop.f32.mrb[73].mxu0 }
 0x490   :  { %v1511_v62 = vadd.f32 %v2056_v60, %v2663_v59  ;;  %v1406_v63 = vadd.f32 %v2663_v59, %v1405_v61  ;;  %v1502_v0 = vpop.f32.mrb[73].mxu1  ;;  %v2025_v1 = vpop.f32.mrb[74].mxu0 }
 0x491   :  { %1544 = vst.msk [vmem:[%s2836_s11 + $0x50] sm:$0xff] %vm1533_vm1, %v1414_v58  ;;  %v1503_v2 = vadd.f32 %v2663_v59, %v1502_v0  ;;  %v1417_v3 = vadd.f32 %v2025_v1, %v2663_v59  ;;  %v2057_v36 = vpop.f32.mrb[74].mxu1  ;;  %v1408_v4 = vpop.f32.mrb[75].mxu0 }
 0x492   :  { %1560 = vst.msk [vmem:[%s2836_s11 + $0xd0] sm:$0xff] %vm1533_vm1, %v1511_v62  ;;  %1542 = vst.msk [vmem:[%s2836_s11 + $0x40] sm:$0xff] %vm1533_vm1, %v1406_v63  ;;  %v1514_v5 = vadd.f32 %v2057_v36, %v2663_v59  ;;  %v1409_v6 = vadd.f32 %v2663_v59, %v1408_v4  ;;  %v1505_v7 = vpop.f32.mrb[75].mxu1 }
 0x493   :  { %1558 = vst.msk [vmem:[%s2836_s11 + $0xc0] sm:$0xff] %vm1533_vm1, %v1503_v2  ;;  %1545 = vst.msk [vmem:[%s2836_s11 + $0x58] sm:$0xff] %vm1533_vm1, %v1417_v3  ;;  %v1506_v8 = vadd.f32 %v2663_v59, %v1505_v7 }
 0x494   :  { %1561 = vst.msk [vmem:[%s2836_s11 + $0xd8] sm:$0xff] %vm1533_vm1, %v1514_v5  ;;  %1543 = vst.msk [vmem:[%s2836_s11 + $0x48] sm:$0xff] %vm1533_vm1, %v1409_v6 }
 0x495   :  { %1559 = vst.msk [vmem:[%s2836_s11 + $0xc8] sm:$0xff] %vm1533_vm1, %v1506_v8 }
 0x496   :  { %v2028_v57 = vpop.f32.mrb[76].mxu0 }
 0x497   :  { %v1430_v9 = vadd.f32 %v2028_v57, %v2663_v59  ;;  %v2060_v10 = vpop.f32.mrb[76].mxu1  ;;  %v1421_v11 = vpop.f32.mrb[77].mxu0 }
 0x498   :  { %v1527_v13 = vadd.f32 %v2060_v10, %v2663_v59  ;;  %v1422_v15 = vadd.f32 %v2663_v59, %v1421_v11  ;;  %v1518_v16 = vpop.f32.mrb[77].mxu1  ;;  %v2029_v17 = vpop.f32.mrb[78].mxu0 }
 0x499   :  { %1548 = vst.msk [vmem:[%s2836_s11 + $0x70] sm:$0xff] %vm1533_vm1, %v1430_v9  ;;  %v1519_v18 = vadd.f32 %v2663_v59, %v1518_v16  ;;  %v1433_v19 = vadd.f32 %v2029_v17, %v2663_v59  ;;  %v2061_v20 = vpop.f32.mrb[78].mxu1  ;;  %v1424_v54 = vpop.f32.mrb[79].mxu0 }
 0x49a   :  { %1564 = vst.msk [vmem:[%s2836_s11 + $0xf0] sm:$0xff] %vm1533_vm1, %v1527_v13  ;;  %1546 = vst.msk [vmem:[%s2836_s11 + $0x60] sm:$0xff] %vm1533_vm1, %v1422_v15  ;;  %v1530_v21 = vadd.f32 %v2061_v20, %v2663_v59  ;;  %v1425_v22 = vadd.f32 %v2663_v59, %v1424_v54  ;;  %v1521_v23 = vpop.f32.mrb[79].mxu1 }
 0x49b   :  { %1562 = vst.msk [vmem:[%s2836_s11 + $0xe0] sm:$0xff] %vm1533_vm1, %v1519_v18  ;;  %1549 = vst.msk [vmem:[%s2836_s11 + $0x78] sm:$0xff] %vm1533_vm1, %v1433_v19  ;;  %v1522_v24 = vadd.f32 %v2663_v59, %v1521_v23 }
 0x49c   :  { %1565 = vst.msk [vmem:[%s2836_s11 + $0xf8] sm:$0xff] %vm1533_vm1, %v1530_v21  ;;  %1547 = vst.msk [vmem:[%s2836_s11 + $0x68] sm:$0xff] %vm1533_vm1, %v1425_v22 }
 0x49d   :  { %1563 = vst.msk [vmem:[%s2836_s11 + $0xe8] sm:$0xff] %vm1533_vm1, %v1522_v24 }

</bundles_post_ra>
